<compile_context>
chip_gen: v5e
topology: v5e:2x2
jax: 0.10.0
libtpu: 0.0.40
codegen_flags: <defaults>
</compile_context>

<pallas_src>
import math

import jax
import jax.numpy as jnp
from jax.experimental import pallas as pl
from jax.experimental.pallas import tpu as pltpu


def _make_fwp_kernel(S, B, V):
    """Build the whole-sequence FWP kernel (all sizes static; NI == NO == V)."""
    NI = NO = V

    def kernel(x_ref, ws_ref, bs_ref, wf_ref, out_ref):
        x2d = x_ref[...]                                    # (S*B, NI) f32
        ws = ws_ref[...]                                    # (NI, SO)
        bs = bs_ref[...]                                    # (1, SO)
        wf = wf_ref[...]                                    # (NI, NO)

        # ---- hoisted off the recurrence: one MXU pass each for the whole seq.
        u_all = jnp.dot(x2d, ws, preferred_element_type=jnp.float32) + bs   # (S*B, SO)
        y_base = jnp.dot(x2d, wf, preferred_element_type=jnp.float32)       # (S*B, NO)

        a1 = u_all[:, 0:V]
        a2 = u_all[:, V:2 * V]
        s1 = u_all[:, 2 * V:3 * V]
        s2 = u_all[:, 3 * V:4 * V]
        sa = jax.nn.sigmoid(u_all[:, 4 * V:4 * V + 1])      # (S*B, 1) add strength
        sb = jax.nn.sigmoid(u_all[:, 4 * V + 1:4 * V + 2])  # (S*B, 1) sub strength

        # ---- all outer products up-front: independent of the carried delta,
        # so no MXU op sits on the serial dependency chain of the recurrence.
        dn = (((0,), (0,)), ((), ()))                       # contract over batch
        add_outer = []
        sub_outer = []
        for t in range(S):
            r0, r1 = t * B, (t + 1) * B
            add_outer.append(jax.lax.dot_general(
                a1[r0:r1], a2[r0:r1], dn, preferred_element_type=jnp.float32))
            sub_outer.append(jax.lax.dot_general(
                s1[r0:r1], s2[r0:r1], dn, preferred_element_type=jnp.float32))

        # ---- the recurrence: fully unrolled straight-line code; delta is a
        # carried value (vregs), no VMEM scratch.  Per step: scale, accumulate,
        # apply (a (B, NI, NO) multiply-reduce -- the true serial minimum).
        delta = jnp.zeros((B, NI, NO), jnp.float32)
        for t in range(S):
            r0, r1 = t * B, (t + 1) * B
            upd = (sa[r0:r1][:, :, None] * add_outer[t][None, :, :]
                   - sb[r0:r1][:, :, None] * sub_outer[t][None, :, :])  # (B,NI,NO)
            delta = delta + upd
            x_t = x2d[r0:r1]                                            # (B, NI)
            y_t = y_base[r0:r1] + jnp.sum(x_t[:, :, None] * delta, axis=1)
            # lane-dense (B, S*NO) output block; single HBM writeback at the end.
            out_ref[:, t * NO:(t + 1) * NO] = y_t.astype(out_ref.dtype)

    return kernel


def fwp_forward(x, ws, bs, wf):
    """x: (S, B, NI); ws: (NI, SO); bs: (1, SO); wf: (NI, NO) -> (S, B, NO)."""
    S, B, NI = x.shape
    SO = ws.shape[1]
    NO = wf.shape[1]
    V = math.ceil(math.sqrt(NI * NO))
    assert SO == 4 * V + 2
    assert NI == NO == V, "kernel relies on square fast weights (see header)"

    x2d = x.reshape(S * B, NI)
    kernel = _make_fwp_kernel(S, B, V)
    out_flat = pl.pallas_call(
        kernel,
        out_shape=jax.ShapeDtypeStruct((B, S * NO), x.dtype),
        grid=(1,),                                          # single invocation
        in_specs=[
            pl.BlockSpec((S * B, NI), lambda i: (0, 0)),    # whole sequence x
            pl.BlockSpec((NI, SO), lambda i: (0, 0)),       # slow weight
            pl.BlockSpec((1, SO), lambda i: (0, 0)),        # slow bias
            pl.BlockSpec((NI, NO), lambda i: (0, 0)),       # fast base weight
        ],
        out_specs=pl.BlockSpec((B, S * NO), lambda i: (0, 0)),
        compiler_params=pltpu.CompilerParams(
            dimension_semantics=("arbitrary",)),
    )(x2d, ws, bs, wf)
    # (B, S*NO) -> (S, B, NO)
    return jnp.transpose(out_flat.reshape(B, S, NO), (1, 0, 2))


def fwp_reference(x, ws, bs, wf):
    """Pure-JAX mirror of the PyTorch forward (general flatten/slice/reshape)."""
    S, B, NI = x.shape
    NO = wf.shape[1]
    P = NI * NO
    V = math.ceil(math.sqrt(P))
    u_all = jnp.einsum("sbi,io->sbo", x, ws) + bs                 # slow model
    delta = jnp.zeros((B, P), jnp.float32)
    outs = []
    for i in range(S):
        u = u_all[i]
        a1, a2 = u[:, :V], u[:, V:2 * V]
        s1, s2 = u[:, 2 * V:3 * V], u[:, 3 * V:4 * V]
        sa = jax.nn.sigmoid(u[:, 4 * V])[:, None]
        sb = jax.nn.sigmoid(u[:, 4 * V + 1])[:, None]
        add = (a1.T @ a2).reshape(1, -1)[:, :P] * sa
        sub = (s1.T @ s2).reshape(1, -1)[:, :P] * sb
        delta = delta + (add - sub)
        w_eff = wf[None, :, :] + delta.reshape(B, NI, NO)
        outs.append(jnp.einsum("bi,bio->bo", x[i], w_eff))
    return jnp.stack(outs, axis=0)


if __name__ == "__main__":
    S, B = 8, 4           # seq length, batch size
    NI = NO = 16          # num_ins == num_outs (square fast model)
    V = math.ceil(math.sqrt(NI * NO))
    SO = 4 * V + 2        # slow_net_outs

    key = jax.random.PRNGKey(0)
    k1, k2, k3, k4 = jax.random.split(key, 4)
    x = jax.random.normal(k1, (S, B, NI), jnp.float32)
    ws = jax.random.normal(k2, (NI, SO), jnp.float32) / math.sqrt(NI)
    bs = jax.random.normal(k3, (1, SO), jnp.float32) * 0.1
    wf = jax.random.normal(k4, (NI, NO), jnp.float32) / math.sqrt(NI)

    out = jax.block_until_ready(fwp_forward(x, ws, bs, wf))
    ref = fwp_reference(x, ws, bs, wf)

    assert out.shape == (S, B, NO)
    assert jnp.allclose(out, ref, atol=1e-2, rtol=1e-3), float(
        jnp.max(jnp.abs(out - ref)))
    print("KERNEL_OK")
</pallas_src>

<mosaic_0001>
module attributes {stable_mosaic.version = 11 : i64} {
  func.func @kernel(%arg0: i32, %arg1: memref<32x16xf32, #tpu.memory_space<vmem>>, %arg2: memref<16x66xf32, #tpu.memory_space<vmem>>, %arg3: memref<1x66xf32, #tpu.memory_space<vmem>>, %arg4: memref<16x16xf32, #tpu.memory_space<vmem>>, %arg5: memref<4x128xf32, #tpu.memory_space<vmem>>) attributes {dimension_semantics = [#tpu.dimension_semantics<arbitrary>], iteration_bounds = array<i64: 1>, scalar_prefetch = 0 : i64, scratch_operands = 0 : i64, tpu.core_type = #tpu.core_type<tc>, window_params = [{pipeline_mode = #tpu.pipeline_mode<synchronous>, transform_indices = @transform_0, window_bounds = array<i64: 32, 16>}, {pipeline_mode = #tpu.pipeline_mode<synchronous>, transform_indices = @transform_1, window_bounds = array<i64: 16, 66>}, {pipeline_mode = #tpu.pipeline_mode<synchronous>, transform_indices = @transform_2, window_bounds = array<i64: 1, 66>}, {pipeline_mode = #tpu.pipeline_mode<synchronous>, transform_indices = @transform_3, window_bounds = array<i64: 16, 16>}, {pipeline_mode = #tpu.pipeline_mode<synchronous>, transform_indices = @transform_4, window_bounds = array<i64: 4, 128>}]} {
    %c0 = arith.constant 0 : index
    %c0_0 = arith.constant 0 : index
    %0 = vector.load %arg1[%c0, %c0_0] : memref<32x16xf32, #tpu.memory_space<vmem>>, vector<32x16xf32>
    %c0_1 = arith.constant 0 : index
    %c0_2 = arith.constant 0 : index
    %1 = vector.load %arg2[%c0_1, %c0_2] : memref<16x66xf32, #tpu.memory_space<vmem>>, vector<16x66xf32>
    %c0_3 = arith.constant 0 : index
    %c0_4 = arith.constant 0 : index
    %2 = vector.load %arg3[%c0_3, %c0_4] : memref<1x66xf32, #tpu.memory_space<vmem>>, vector<1x66xf32>
    %c0_5 = arith.constant 0 : index
    %c0_6 = arith.constant 0 : index
    %3 = vector.load %arg4[%c0_5, %c0_6] : memref<16x16xf32, #tpu.memory_space<vmem>>, vector<16x16xf32>
    %cst = arith.constant dense<0.000000e+00> : vector<32x66xf32>
    %4 = tpu.matmul %0, %1, %cst {dimension_numbers = #tpu.dot_dimension_numbers<[1], [0], [0], [1], [0, 0, 1, 1], [], []>} : vector<32x16xf32>, vector<16x66xf32>, vector<32x66xf32> -> vector<32x66xf32>
    %5 = vector.broadcast %2 : vector<1x66xf32> to vector<32x66xf32>
    %6 = arith.addf %4, %5 : vector<32x66xf32>
    %cst_7 = arith.constant dense<0.000000e+00> : vector<32x16xf32>
    %7 = tpu.matmul %0, %3, %cst_7 {dimension_numbers = #tpu.dot_dimension_numbers<[1], [0], [0], [1], [0, 0, 1, 1], [], []>} : vector<32x16xf32>, vector<16x16xf32>, vector<32x16xf32> -> vector<32x16xf32>
    %8 = vector.extract_strided_slice %6 {offsets = [0, 0], sizes = [32, 16], strides = [1, 1]} : vector<32x66xf32> to vector<32x16xf32>
    %9 = vector.extract_strided_slice %6 {offsets = [0, 16], sizes = [32, 16], strides = [1, 1]} : vector<32x66xf32> to vector<32x16xf32>
    %10 = vector.extract_strided_slice %6 {offsets = [0, 32], sizes = [32, 16], strides = [1, 1]} : vector<32x66xf32> to vector<32x16xf32>
    %11 = vector.extract_strided_slice %6 {offsets = [0, 48], sizes = [32, 16], strides = [1, 1]} : vector<32x66xf32> to vector<32x16xf32>
    %12 = vector.extract_strided_slice %6 {offsets = [0, 64], sizes = [32, 1], strides = [1, 1]} : vector<32x66xf32> to vector<32x1xf32>
    %13 = arith.negf %12 : vector<32x1xf32>
    %14 = math.exp %13 : vector<32x1xf32>
    %cst_8 = arith.constant 1.000000e+00 : f32
    %15 = vector.broadcast %cst_8 : f32 to vector<32x1xf32>
    %16 = arith.addf %15, %14 : vector<32x1xf32>
    %17 = arith.divf %15, %16 : vector<32x1xf32>
    %18 = vector.extract_strided_slice %6 {offsets = [0, 65], sizes = [32, 1], strides = [1, 1]} : vector<32x66xf32> to vector<32x1xf32>
    %19 = arith.negf %18 : vector<32x1xf32>
    %20 = math.exp %19 : vector<32x1xf32>
    %cst_9 = arith.constant 1.000000e+00 : f32
    %21 = vector.broadcast %cst_9 : f32 to vector<32x1xf32>
    %22 = arith.addf %21, %20 : vector<32x1xf32>
    %23 = arith.divf %21, %22 : vector<32x1xf32>
    %24 = vector.extract_strided_slice %8 {offsets = [0, 0], sizes = [4, 16], strides = [1, 1]} : vector<32x16xf32> to vector<4x16xf32>
    %25 = vector.extract_strided_slice %9 {offsets = [0, 0], sizes = [4, 16], strides = [1, 1]} : vector<32x16xf32> to vector<4x16xf32>
    %cst_10 = arith.constant dense<0.000000e+00> : vector<16x16xf32>
    %26 = tpu.matmul %24, %25, %cst_10 {dimension_numbers = #tpu.dot_dimension_numbers<[0], [0], [1], [1], [0, 1, 1, 1], [], []>} : vector<4x16xf32>, vector<4x16xf32>, vector<16x16xf32> -> vector<16x16xf32>
    %27 = vector.extract_strided_slice %10 {offsets = [0, 0], sizes = [4, 16], strides = [1, 1]} : vector<32x16xf32> to vector<4x16xf32>
    %28 = vector.extract_strided_slice %11 {offsets = [0, 0], sizes = [4, 16], strides = [1, 1]} : vector<32x16xf32> to vector<4x16xf32>
    %cst_11 = arith.constant dense<0.000000e+00> : vector<16x16xf32>
    %29 = tpu.matmul %27, %28, %cst_11 {dimension_numbers = #tpu.dot_dimension_numbers<[0], [0], [1], [1], [0, 1, 1, 1], [], []>} : vector<4x16xf32>, vector<4x16xf32>, vector<16x16xf32> -> vector<16x16xf32>
    %30 = vector.extract_strided_slice %8 {offsets = [4, 0], sizes = [4, 16], strides = [1, 1]} : vector<32x16xf32> to vector<4x16xf32>
    %31 = vector.extract_strided_slice %9 {offsets = [4, 0], sizes = [4, 16], strides = [1, 1]} : vector<32x16xf32> to vector<4x16xf32>
    %cst_12 = arith.constant dense<0.000000e+00> : vector<16x16xf32>
    %32 = tpu.matmul %30, %31, %cst_12 {dimension_numbers = #tpu.dot_dimension_numbers<[0], [0], [1], [1], [0, 1, 1, 1], [], []>} : vector<4x16xf32>, vector<4x16xf32>, vector<16x16xf32> -> vector<16x16xf32>
    %33 = vector.extract_strided_slice %10 {offsets = [4, 0], sizes = [4, 16], strides = [1, 1]} : vector<32x16xf32> to vector<4x16xf32>
    %34 = vector.extract_strided_slice %11 {offsets = [4, 0], sizes = [4, 16], strides = [1, 1]} : vector<32x16xf32> to vector<4x16xf32>
    %cst_13 = arith.constant dense<0.000000e+00> : vector<16x16xf32>
    %35 = tpu.matmul %33, %34, %cst_13 {dimension_numbers = #tpu.dot_dimension_numbers<[0], [0], [1], [1], [0, 1, 1, 1], [], []>} : vector<4x16xf32>, vector<4x16xf32>, vector<16x16xf32> -> vector<16x16xf32>
    %36 = vector.extract_strided_slice %8 {offsets = [8, 0], sizes = [4, 16], strides = [1, 1]} : vector<32x16xf32> to vector<4x16xf32>
    %37 = vector.extract_strided_slice %9 {offsets = [8, 0], sizes = [4, 16], strides = [1, 1]} : vector<32x16xf32> to vector<4x16xf32>
    %cst_14 = arith.constant dense<0.000000e+00> : vector<16x16xf32>
    %38 = tpu.matmul %36, %37, %cst_14 {dimension_numbers = #tpu.dot_dimension_numbers<[0], [0], [1], [1], [0, 1, 1, 1], [], []>} : vector<4x16xf32>, vector<4x16xf32>, vector<16x16xf32> -> vector<16x16xf32>
    %39 = vector.extract_strided_slice %10 {offsets = [8, 0], sizes = [4, 16], strides = [1, 1]} : vector<32x16xf32> to vector<4x16xf32>
    %40 = vector.extract_strided_slice %11 {offsets = [8, 0], sizes = [4, 16], strides = [1, 1]} : vector<32x16xf32> to vector<4x16xf32>
    %cst_15 = arith.constant dense<0.000000e+00> : vector<16x16xf32>
    %41 = tpu.matmul %39, %40, %cst_15 {dimension_numbers = #tpu.dot_dimension_numbers<[0], [0], [1], [1], [0, 1, 1, 1], [], []>} : vector<4x16xf32>, vector<4x16xf32>, vector<16x16xf32> -> vector<16x16xf32>
    %42 = vector.extract_strided_slice %8 {offsets = [12, 0], sizes = [4, 16], strides = [1, 1]} : vector<32x16xf32> to vector<4x16xf32>
    %43 = vector.extract_strided_slice %9 {offsets = [12, 0], sizes = [4, 16], strides = [1, 1]} : vector<32x16xf32> to vector<4x16xf32>
    %cst_16 = arith.constant dense<0.000000e+00> : vector<16x16xf32>
    %44 = tpu.matmul %42, %43, %cst_16 {dimension_numbers = #tpu.dot_dimension_numbers<[0], [0], [1], [1], [0, 1, 1, 1], [], []>} : vector<4x16xf32>, vector<4x16xf32>, vector<16x16xf32> -> vector<16x16xf32>
    %45 = vector.extract_strided_slice %10 {offsets = [12, 0], sizes = [4, 16], strides = [1, 1]} : vector<32x16xf32> to vector<4x16xf32>
    %46 = vector.extract_strided_slice %11 {offsets = [12, 0], sizes = [4, 16], strides = [1, 1]} : vector<32x16xf32> to vector<4x16xf32>
    %cst_17 = arith.constant dense<0.000000e+00> : vector<16x16xf32>
    %47 = tpu.matmul %45, %46, %cst_17 {dimension_numbers = #tpu.dot_dimension_numbers<[0], [0], [1], [1], [0, 1, 1, 1], [], []>} : vector<4x16xf32>, vector<4x16xf32>, vector<16x16xf32> -> vector<16x16xf32>
    %48 = vector.extract_strided_slice %8 {offsets = [16, 0], sizes = [4, 16], strides = [1, 1]} : vector<32x16xf32> to vector<4x16xf32>
    %49 = vector.extract_strided_slice %9 {offsets = [16, 0], sizes = [4, 16], strides = [1, 1]} : vector<32x16xf32> to vector<4x16xf32>
    %cst_18 = arith.constant dense<0.000000e+00> : vector<16x16xf32>
    %50 = tpu.matmul %48, %49, %cst_18 {dimension_numbers = #tpu.dot_dimension_numbers<[0], [0], [1], [1], [0, 1, 1, 1], [], []>} : vector<4x16xf32>, vector<4x16xf32>, vector<16x16xf32> -> vector<16x16xf32>
    %51 = vector.extract_strided_slice %10 {offsets = [16, 0], sizes = [4, 16], strides = [1, 1]} : vector<32x16xf32> to vector<4x16xf32>
    %52 = vector.extract_strided_slice %11 {offsets = [16, 0], sizes = [4, 16], strides = [1, 1]} : vector<32x16xf32> to vector<4x16xf32>
    %cst_19 = arith.constant dense<0.000000e+00> : vector<16x16xf32>
    %53 = tpu.matmul %51, %52, %cst_19 {dimension_numbers = #tpu.dot_dimension_numbers<[0], [0], [1], [1], [0, 1, 1, 1], [], []>} : vector<4x16xf32>, vector<4x16xf32>, vector<16x16xf32> -> vector<16x16xf32>
    %54 = vector.extract_strided_slice %8 {offsets = [20, 0], sizes = [4, 16], strides = [1, 1]} : vector<32x16xf32> to vector<4x16xf32>
    %55 = vector.extract_strided_slice %9 {offsets = [20, 0], sizes = [4, 16], strides = [1, 1]} : vector<32x16xf32> to vector<4x16xf32>
    %cst_20 = arith.constant dense<0.000000e+00> : vector<16x16xf32>
    %56 = tpu.matmul %54, %55, %cst_20 {dimension_numbers = #tpu.dot_dimension_numbers<[0], [0], [1], [1], [0, 1, 1, 1], [], []>} : vector<4x16xf32>, vector<4x16xf32>, vector<16x16xf32> -> vector<16x16xf32>
    %57 = vector.extract_strided_slice %10 {offsets = [20, 0], sizes = [4, 16], strides = [1, 1]} : vector<32x16xf32> to vector<4x16xf32>
    %58 = vector.extract_strided_slice %11 {offsets = [20, 0], sizes = [4, 16], strides = [1, 1]} : vector<32x16xf32> to vector<4x16xf32>
    %cst_21 = arith.constant dense<0.000000e+00> : vector<16x16xf32>
    %59 = tpu.matmul %57, %58, %cst_21 {dimension_numbers = #tpu.dot_dimension_numbers<[0], [0], [1], [1], [0, 1, 1, 1], [], []>} : vector<4x16xf32>, vector<4x16xf32>, vector<16x16xf32> -> vector<16x16xf32>
    %60 = vector.extract_strided_slice %8 {offsets = [24, 0], sizes = [4, 16], strides = [1, 1]} : vector<32x16xf32> to vector<4x16xf32>
    %61 = vector.extract_strided_slice %9 {offsets = [24, 0], sizes = [4, 16], strides = [1, 1]} : vector<32x16xf32> to vector<4x16xf32>
    %cst_22 = arith.constant dense<0.000000e+00> : vector<16x16xf32>
    %62 = tpu.matmul %60, %61, %cst_22 {dimension_numbers = #tpu.dot_dimension_numbers<[0], [0], [1], [1], [0, 1, 1, 1], [], []>} : vector<4x16xf32>, vector<4x16xf32>, vector<16x16xf32> -> vector<16x16xf32>
    %63 = vector.extract_strided_slice %10 {offsets = [24, 0], sizes = [4, 16], strides = [1, 1]} : vector<32x16xf32> to vector<4x16xf32>
    %64 = vector.extract_strided_slice %11 {offsets = [24, 0], sizes = [4, 16], strides = [1, 1]} : vector<32x16xf32> to vector<4x16xf32>
    %cst_23 = arith.constant dense<0.000000e+00> : vector<16x16xf32>
    %65 = tpu.matmul %63, %64, %cst_23 {dimension_numbers = #tpu.dot_dimension_numbers<[0], [0], [1], [1], [0, 1, 1, 1], [], []>} : vector<4x16xf32>, vector<4x16xf32>, vector<16x16xf32> -> vector<16x16xf32>
    %66 = vector.extract_strided_slice %8 {offsets = [28, 0], sizes = [4, 16], strides = [1, 1]} : vector<32x16xf32> to vector<4x16xf32>
    %67 = vector.extract_strided_slice %9 {offsets = [28, 0], sizes = [4, 16], strides = [1, 1]} : vector<32x16xf32> to vector<4x16xf32>
    %cst_24 = arith.constant dense<0.000000e+00> : vector<16x16xf32>
    %68 = tpu.matmul %66, %67, %cst_24 {dimension_numbers = #tpu.dot_dimension_numbers<[0], [0], [1], [1], [0, 1, 1, 1], [], []>} : vector<4x16xf32>, vector<4x16xf32>, vector<16x16xf32> -> vector<16x16xf32>
    %69 = vector.extract_strided_slice %10 {offsets = [28, 0], sizes = [4, 16], strides = [1, 1]} : vector<32x16xf32> to vector<4x16xf32>
    %70 = vector.extract_strided_slice %11 {offsets = [28, 0], sizes = [4, 16], strides = [1, 1]} : vector<32x16xf32> to vector<4x16xf32>
    %cst_25 = arith.constant dense<0.000000e+00> : vector<16x16xf32>
    %71 = tpu.matmul %69, %70, %cst_25 {dimension_numbers = #tpu.dot_dimension_numbers<[0], [0], [1], [1], [0, 1, 1, 1], [], []>} : vector<4x16xf32>, vector<4x16xf32>, vector<16x16xf32> -> vector<16x16xf32>
    %cst_26 = arith.constant 0.000000e+00 : f32
    %72 = vector.broadcast %cst_26 : f32 to vector<4x16x16xf32>
    %73 = vector.extract_strided_slice %17 {offsets = [0, 0], sizes = [4, 1], strides = [1, 1]} : vector<32x1xf32> to vector<4x1xf32>
    %74 = vector.shape_cast %73 : vector<4x1xf32> to vector<4x1x1xf32>
    %75 = vector.shape_cast %26 : vector<16x16xf32> to vector<1x16x16xf32>
    %76 = vector.broadcast %74 : vector<4x1x1xf32> to vector<4x16x16xf32>
    %77 = vector.broadcast %75 : vector<1x16x16xf32> to vector<4x16x16xf32>
    %78 = arith.mulf %76, %77 : vector<4x16x16xf32>
    %79 = vector.extract_strided_slice %23 {offsets = [0, 0], sizes = [4, 1], strides = [1, 1]} : vector<32x1xf32> to vector<4x1xf32>
    %80 = vector.shape_cast %79 : vector<4x1xf32> to vector<4x1x1xf32>
    %81 = vector.shape_cast %29 : vector<16x16xf32> to vector<1x16x16xf32>
    %82 = vector.broadcast %80 : vector<4x1x1xf32> to vector<4x16x16xf32>
    %83 = vector.broadcast %81 : vector<1x16x16xf32> to vector<4x16x16xf32>
    %84 = arith.mulf %82, %83 : vector<4x16x16xf32>
    %85 = arith.subf %78, %84 : vector<4x16x16xf32>
    %86 = arith.addf %72, %85 : vector<4x16x16xf32>
    %87 = vector.extract_strided_slice %0 {offsets = [0, 0], sizes = [4, 16], strides = [1, 1]} : vector<32x16xf32> to vector<4x16xf32>
    %88 = vector.extract_strided_slice %7 {offsets = [0, 0], sizes = [4, 16], strides = [1, 1]} : vector<32x16xf32> to vector<4x16xf32>
    %89 = vector.shape_cast %87 : vector<4x16xf32> to vector<4x16x1xf32>
    %90 = vector.broadcast %89 : vector<4x16x1xf32> to vector<4x16x16xf32>
    %91 = arith.mulf %90, %86 : vector<4x16x16xf32>
    %cst_27 = arith.constant dense<0.000000e+00> : vector<4x16xf32>
    %92 = vector.multi_reduction <add>, %91, %cst_27 [1] : vector<4x16x16xf32> to vector<4x16xf32>
    %93 = arith.addf %88, %92 : vector<4x16xf32>
    %c0_28 = arith.constant 0 : index
    %c0_29 = arith.constant 0 : index
    %94 = vector.load %arg5[%c0_28, %c0_29] : memref<4x128xf32, #tpu.memory_space<vmem>>, vector<4x16xf32>
    tpu.vector_store %arg5[%c0_28, %c0_29], %93 {strides = array<i32>} : memref<4x128xf32, #tpu.memory_space<vmem>>, vector<4x16xf32>,
    %95 = vector.extract_strided_slice %17 {offsets = [4, 0], sizes = [4, 1], strides = [1, 1]} : vector<32x1xf32> to vector<4x1xf32>
    %96 = vector.shape_cast %95 : vector<4x1xf32> to vector<4x1x1xf32>
    %97 = vector.shape_cast %32 : vector<16x16xf32> to vector<1x16x16xf32>
    %98 = vector.broadcast %96 : vector<4x1x1xf32> to vector<4x16x16xf32>
    %99 = vector.broadcast %97 : vector<1x16x16xf32> to vector<4x16x16xf32>
    %100 = arith.mulf %98, %99 : vector<4x16x16xf32>
    %101 = vector.extract_strided_slice %23 {offsets = [4, 0], sizes = [4, 1], strides = [1, 1]} : vector<32x1xf32> to vector<4x1xf32>
    %102 = vector.shape_cast %101 : vector<4x1xf32> to vector<4x1x1xf32>
    %103 = vector.shape_cast %35 : vector<16x16xf32> to vector<1x16x16xf32>
    %104 = vector.broadcast %102 : vector<4x1x1xf32> to vector<4x16x16xf32>
    %105 = vector.broadcast %103 : vector<1x16x16xf32> to vector<4x16x16xf32>
    %106 = arith.mulf %104, %105 : vector<4x16x16xf32>
    %107 = arith.subf %100, %106 : vector<4x16x16xf32>
    %108 = arith.addf %86, %107 : vector<4x16x16xf32>
    %109 = vector.extract_strided_slice %0 {offsets = [4, 0], sizes = [4, 16], strides = [1, 1]} : vector<32x16xf32> to vector<4x16xf32>
    %110 = vector.extract_strided_slice %7 {offsets = [4, 0], sizes = [4, 16], strides = [1, 1]} : vector<32x16xf32> to vector<4x16xf32>
    %111 = vector.shape_cast %109 : vector<4x16xf32> to vector<4x16x1xf32>
    %112 = vector.broadcast %111 : vector<4x16x1xf32> to vector<4x16x16xf32>
    %113 = arith.mulf %112, %108 : vector<4x16x16xf32>
    %cst_30 = arith.constant dense<0.000000e+00> : vector<4x16xf32>
    %114 = vector.multi_reduction <add>, %113, %cst_30 [1] : vector<4x16x16xf32> to vector<4x16xf32>
    %115 = arith.addf %110, %114 : vector<4x16xf32>
    %c0_31 = arith.constant 0 : index
    %c16 = arith.constant 16 : index
    %116 = vector.load %arg5[%c0_31, %c16] : memref<4x128xf32, #tpu.memory_space<vmem>>, vector<4x16xf32>
    tpu.vector_store %arg5[%c0_31, %c16], %115 {strides = array<i32>} : memref<4x128xf32, #tpu.memory_space<vmem>>, vector<4x16xf32>,
    %117 = vector.extract_strided_slice %17 {offsets = [8, 0], sizes = [4, 1], strides = [1, 1]} : vector<32x1xf32> to vector<4x1xf32>
    %118 = vector.shape_cast %117 : vector<4x1xf32> to vector<4x1x1xf32>
    %119 = vector.shape_cast %38 : vector<16x16xf32> to vector<1x16x16xf32>
    %120 = vector.broadcast %118 : vector<4x1x1xf32> to vector<4x16x16xf32>
    %121 = vector.broadcast %119 : vector<1x16x16xf32> to vector<4x16x16xf32>
    %122 = arith.mulf %120, %121 : vector<4x16x16xf32>
    %123 = vector.extract_strided_slice %23 {offsets = [8, 0], sizes = [4, 1], strides = [1, 1]} : vector<32x1xf32> to vector<4x1xf32>
    %124 = vector.shape_cast %123 : vector<4x1xf32> to vector<4x1x1xf32>
    %125 = vector.shape_cast %41 : vector<16x16xf32> to vector<1x16x16xf32>
    %126 = vector.broadcast %124 : vector<4x1x1xf32> to vector<4x16x16xf32>
    %127 = vector.broadcast %125 : vector<1x16x16xf32> to vector<4x16x16xf32>
    %128 = arith.mulf %126, %127 : vector<4x16x16xf32>
    %129 = arith.subf %122, %128 : vector<4x16x16xf32>
    %130 = arith.addf %108, %129 : vector<4x16x16xf32>
    %131 = vector.extract_strided_slice %0 {offsets = [8, 0], sizes = [4, 16], strides = [1, 1]} : vector<32x16xf32> to vector<4x16xf32>
    %132 = vector.extract_strided_slice %7 {offsets = [8, 0], sizes = [4, 16], strides = [1, 1]} : vector<32x16xf32> to vector<4x16xf32>
    %133 = vector.shape_cast %131 : vector<4x16xf32> to vector<4x16x1xf32>
    %134 = vector.broadcast %133 : vector<4x16x1xf32> to vector<4x16x16xf32>
    %135 = arith.mulf %134, %130 : vector<4x16x16xf32>
    %cst_32 = arith.constant dense<0.000000e+00> : vector<4x16xf32>
    %136 = vector.multi_reduction <add>, %135, %cst_32 [1] : vector<4x16x16xf32> to vector<4x16xf32>
    %137 = arith.addf %132, %136 : vector<4x16xf32>
    %c0_33 = arith.constant 0 : index
    %c32 = arith.constant 32 : index
    %138 = vector.load %arg5[%c0_33, %c32] : memref<4x128xf32, #tpu.memory_space<vmem>>, vector<4x16xf32>
    tpu.vector_store %arg5[%c0_33, %c32], %137 {strides = array<i32>} : memref<4x128xf32, #tpu.memory_space<vmem>>, vector<4x16xf32>,
    %139 = vector.extract_strided_slice %17 {offsets = [12, 0], sizes = [4, 1], strides = [1, 1]} : vector<32x1xf32> to vector<4x1xf32>
    %140 = vector.shape_cast %139 : vector<4x1xf32> to vector<4x1x1xf32>
    %141 = vector.shape_cast %44 : vector<16x16xf32> to vector<1x16x16xf32>
    %142 = vector.broadcast %140 : vector<4x1x1xf32> to vector<4x16x16xf32>
    %143 = vector.broadcast %141 : vector<1x16x16xf32> to vector<4x16x16xf32>
    %144 = arith.mulf %142, %143 : vector<4x16x16xf32>
    %145 = vector.extract_strided_slice %23 {offsets = [12, 0], sizes = [4, 1], strides = [1, 1]} : vector<32x1xf32> to vector<4x1xf32>
    %146 = vector.shape_cast %145 : vector<4x1xf32> to vector<4x1x1xf32>
    %147 = vector.shape_cast %47 : vector<16x16xf32> to vector<1x16x16xf32>
    %148 = vector.broadcast %146 : vector<4x1x1xf32> to vector<4x16x16xf32>
    %149 = vector.broadcast %147 : vector<1x16x16xf32> to vector<4x16x16xf32>
    %150 = arith.mulf %148, %149 : vector<4x16x16xf32>
    %151 = arith.subf %144, %150 : vector<4x16x16xf32>
    %152 = arith.addf %130, %151 : vector<4x16x16xf32>
    %153 = vector.extract_strided_slice %0 {offsets = [12, 0], sizes = [4, 16], strides = [1, 1]} : vector<32x16xf32> to vector<4x16xf32>
    %154 = vector.extract_strided_slice %7 {offsets = [12, 0], sizes = [4, 16], strides = [1, 1]} : vector<32x16xf32> to vector<4x16xf32>
    %155 = vector.shape_cast %153 : vector<4x16xf32> to vector<4x16x1xf32>
    %156 = vector.broadcast %155 : vector<4x16x1xf32> to vector<4x16x16xf32>
    %157 = arith.mulf %156, %152 : vector<4x16x16xf32>
    %cst_34 = arith.constant dense<0.000000e+00> : vector<4x16xf32>
    %158 = vector.multi_reduction <add>, %157, %cst_34 [1] : vector<4x16x16xf32> to vector<4x16xf32>
    %159 = arith.addf %154, %158 : vector<4x16xf32>
    %c0_35 = arith.constant 0 : index
    %c48 = arith.constant 48 : index
    %160 = vector.load %arg5[%c0_35, %c48] : memref<4x128xf32, #tpu.memory_space<vmem>>, vector<4x16xf32>
    tpu.vector_store %arg5[%c0_35, %c48], %159 {strides = array<i32>} : memref<4x128xf32, #tpu.memory_space<vmem>>, vector<4x16xf32>,
    %161 = vector.extract_strided_slice %17 {offsets = [16, 0], sizes = [4, 1], strides = [1, 1]} : vector<32x1xf32> to vector<4x1xf32>
    %162 = vector.shape_cast %161 : vector<4x1xf32> to vector<4x1x1xf32>
    %163 = vector.shape_cast %50 : vector<16x16xf32> to vector<1x16x16xf32>
    %164 = vector.broadcast %162 : vector<4x1x1xf32> to vector<4x16x16xf32>
    %165 = vector.broadcast %163 : vector<1x16x16xf32> to vector<4x16x16xf32>
    %166 = arith.mulf %164, %165 : vector<4x16x16xf32>
    %167 = vector.extract_strided_slice %23 {offsets = [16, 0], sizes = [4, 1], strides = [1, 1]} : vector<32x1xf32> to vector<4x1xf32>
    %168 = vector.shape_cast %167 : vector<4x1xf32> to vector<4x1x1xf32>
    %169 = vector.shape_cast %53 : vector<16x16xf32> to vector<1x16x16xf32>
    %170 = vector.broadcast %168 : vector<4x1x1xf32> to vector<4x16x16xf32>
    %171 = vector.broadcast %169 : vector<1x16x16xf32> to vector<4x16x16xf32>
    %172 = arith.mulf %170, %171 : vector<4x16x16xf32>
    %173 = arith.subf %166, %172 : vector<4x16x16xf32>
    %174 = arith.addf %152, %173 : vector<4x16x16xf32>
    %175 = vector.extract_strided_slice %0 {offsets = [16, 0], sizes = [4, 16], strides = [1, 1]} : vector<32x16xf32> to vector<4x16xf32>
    %176 = vector.extract_strided_slice %7 {offsets = [16, 0], sizes = [4, 16], strides = [1, 1]} : vector<32x16xf32> to vector<4x16xf32>
    %177 = vector.shape_cast %175 : vector<4x16xf32> to vector<4x16x1xf32>
    %178 = vector.broadcast %177 : vector<4x16x1xf32> to vector<4x16x16xf32>
    %179 = arith.mulf %178, %174 : vector<4x16x16xf32>
    %cst_36 = arith.constant dense<0.000000e+00> : vector<4x16xf32>
    %180 = vector.multi_reduction <add>, %179, %cst_36 [1] : vector<4x16x16xf32> to vector<4x16xf32>
    %181 = arith.addf %176, %180 : vector<4x16xf32>
    %c0_37 = arith.constant 0 : index
    %c64 = arith.constant 64 : index
    %182 = vector.load %arg5[%c0_37, %c64] : memref<4x128xf32, #tpu.memory_space<vmem>>, vector<4x16xf32>
    tpu.vector_store %arg5[%c0_37, %c64], %181 {strides = array<i32>} : memref<4x128xf32, #tpu.memory_space<vmem>>, vector<4x16xf32>,
    %183 = vector.extract_strided_slice %17 {offsets = [20, 0], sizes = [4, 1], strides = [1, 1]} : vector<32x1xf32> to vector<4x1xf32>
    %184 = vector.shape_cast %183 : vector<4x1xf32> to vector<4x1x1xf32>
    %185 = vector.shape_cast %56 : vector<16x16xf32> to vector<1x16x16xf32>
    %186 = vector.broadcast %184 : vector<4x1x1xf32> to vector<4x16x16xf32>
    %187 = vector.broadcast %185 : vector<1x16x16xf32> to vector<4x16x16xf32>
    %188 = arith.mulf %186, %187 : vector<4x16x16xf32>
    %189 = vector.extract_strided_slice %23 {offsets = [20, 0], sizes = [4, 1], strides = [1, 1]} : vector<32x1xf32> to vector<4x1xf32>
    %190 = vector.shape_cast %189 : vector<4x1xf32> to vector<4x1x1xf32>
    %191 = vector.shape_cast %59 : vector<16x16xf32> to vector<1x16x16xf32>
    %192 = vector.broadcast %190 : vector<4x1x1xf32> to vector<4x16x16xf32>
    %193 = vector.broadcast %191 : vector<1x16x16xf32> to vector<4x16x16xf32>
    %194 = arith.mulf %192, %193 : vector<4x16x16xf32>
    %195 = arith.subf %188, %194 : vector<4x16x16xf32>
    %196 = arith.addf %174, %195 : vector<4x16x16xf32>
    %197 = vector.extract_strided_slice %0 {offsets = [20, 0], sizes = [4, 16], strides = [1, 1]} : vector<32x16xf32> to vector<4x16xf32>
    %198 = vector.extract_strided_slice %7 {offsets = [20, 0], sizes = [4, 16], strides = [1, 1]} : vector<32x16xf32> to vector<4x16xf32>
    %199 = vector.shape_cast %197 : vector<4x16xf32> to vector<4x16x1xf32>
    %200 = vector.broadcast %199 : vector<4x16x1xf32> to vector<4x16x16xf32>
    %201 = arith.mulf %200, %196 : vector<4x16x16xf32>
    %cst_38 = arith.constant dense<0.000000e+00> : vector<4x16xf32>
    %202 = vector.multi_reduction <add>, %201, %cst_38 [1] : vector<4x16x16xf32> to vector<4x16xf32>
    %203 = arith.addf %198, %202 : vector<4x16xf32>
    %c0_39 = arith.constant 0 : index
    %c80 = arith.constant 80 : index
    %204 = vector.load %arg5[%c0_39, %c80] : memref<4x128xf32, #tpu.memory_space<vmem>>, vector<4x16xf32>
    tpu.vector_store %arg5[%c0_39, %c80], %203 {strides = array<i32>} : memref<4x128xf32, #tpu.memory_space<vmem>>, vector<4x16xf32>,
    %205 = vector.extract_strided_slice %17 {offsets = [24, 0], sizes = [4, 1], strides = [1, 1]} : vector<32x1xf32> to vector<4x1xf32>
    %206 = vector.shape_cast %205 : vector<4x1xf32> to vector<4x1x1xf32>
    %207 = vector.shape_cast %62 : vector<16x16xf32> to vector<1x16x16xf32>
    %208 = vector.broadcast %206 : vector<4x1x1xf32> to vector<4x16x16xf32>
    %209 = vector.broadcast %207 : vector<1x16x16xf32> to vector<4x16x16xf32>
    %210 = arith.mulf %208, %209 : vector<4x16x16xf32>
    %211 = vector.extract_strided_slice %23 {offsets = [24, 0], sizes = [4, 1], strides = [1, 1]} : vector<32x1xf32> to vector<4x1xf32>
    %212 = vector.shape_cast %211 : vector<4x1xf32> to vector<4x1x1xf32>
    %213 = vector.shape_cast %65 : vector<16x16xf32> to vector<1x16x16xf32>
    %214 = vector.broadcast %212 : vector<4x1x1xf32> to vector<4x16x16xf32>
    %215 = vector.broadcast %213 : vector<1x16x16xf32> to vector<4x16x16xf32>
    %216 = arith.mulf %214, %215 : vector<4x16x16xf32>
    %217 = arith.subf %210, %216 : vector<4x16x16xf32>
    %218 = arith.addf %196, %217 : vector<4x16x16xf32>
    %219 = vector.extract_strided_slice %0 {offsets = [24, 0], sizes = [4, 16], strides = [1, 1]} : vector<32x16xf32> to vector<4x16xf32>
    %220 = vector.extract_strided_slice %7 {offsets = [24, 0], sizes = [4, 16], strides = [1, 1]} : vector<32x16xf32> to vector<4x16xf32>
    %221 = vector.shape_cast %219 : vector<4x16xf32> to vector<4x16x1xf32>
    %222 = vector.broadcast %221 : vector<4x16x1xf32> to vector<4x16x16xf32>
    %223 = arith.mulf %222, %218 : vector<4x16x16xf32>
    %cst_40 = arith.constant dense<0.000000e+00> : vector<4x16xf32>
    %224 = vector.multi_reduction <add>, %223, %cst_40 [1] : vector<4x16x16xf32> to vector<4x16xf32>
    %225 = arith.addf %220, %224 : vector<4x16xf32>
    %c0_41 = arith.constant 0 : index
    %c96 = arith.constant 96 : index
    %226 = vector.load %arg5[%c0_41, %c96] : memref<4x128xf32, #tpu.memory_space<vmem>>, vector<4x16xf32>
    tpu.vector_store %arg5[%c0_41, %c96], %225 {strides = array<i32>} : memref<4x128xf32, #tpu.memory_space<vmem>>, vector<4x16xf32>,
    %227 = vector.extract_strided_slice %17 {offsets = [28, 0], sizes = [4, 1], strides = [1, 1]} : vector<32x1xf32> to vector<4x1xf32>
    %228 = vector.shape_cast %227 : vector<4x1xf32> to vector<4x1x1xf32>
    %229 = vector.shape_cast %68 : vector<16x16xf32> to vector<1x16x16xf32>
    %230 = vector.broadcast %228 : vector<4x1x1xf32> to vector<4x16x16xf32>
    %231 = vector.broadcast %229 : vector<1x16x16xf32> to vector<4x16x16xf32>
    %232 = arith.mulf %230, %231 : vector<4x16x16xf32>
    %233 = vector.extract_strided_slice %23 {offsets = [28, 0], sizes = [4, 1], strides = [1, 1]} : vector<32x1xf32> to vector<4x1xf32>
    %234 = vector.shape_cast %233 : vector<4x1xf32> to vector<4x1x1xf32>
    %235 = vector.shape_cast %71 : vector<16x16xf32> to vector<1x16x16xf32>
    %236 = vector.broadcast %234 : vector<4x1x1xf32> to vector<4x16x16xf32>
    %237 = vector.broadcast %235 : vector<1x16x16xf32> to vector<4x16x16xf32>
    %238 = arith.mulf %236, %237 : vector<4x16x16xf32>
    %239 = arith.subf %232, %238 : vector<4x16x16xf32>
    %240 = arith.addf %218, %239 : vector<4x16x16xf32>
    %241 = vector.extract_strided_slice %0 {offsets = [28, 0], sizes = [4, 16], strides = [1, 1]} : vector<32x16xf32> to vector<4x16xf32>
    %242 = vector.extract_strided_slice %7 {offsets = [28, 0], sizes = [4, 16], strides = [1, 1]} : vector<32x16xf32> to vector<4x16xf32>
    %243 = vector.shape_cast %241 : vector<4x16xf32> to vector<4x16x1xf32>
    %244 = vector.broadcast %243 : vector<4x16x1xf32> to vector<4x16x16xf32>
    %245 = arith.mulf %244, %240 : vector<4x16x16xf32>
    %cst_42 = arith.constant dense<0.000000e+00> : vector<4x16xf32>
    %246 = vector.multi_reduction <add>, %245, %cst_42 [1] : vector<4x16x16xf32> to vector<4x16xf32>
    %247 = arith.addf %242, %246 : vector<4x16xf32>
    %c0_43 = arith.constant 0 : index
    %c112 = arith.constant 112 : index
    %248 = vector.load %arg5[%c0_43, %c112] : memref<4x128xf32, #tpu.memory_space<vmem>>, vector<4x16xf32>
    tpu.vector_store %arg5[%c0_43, %c112], %247 {strides = array<i32>} : memref<4x128xf32, #tpu.memory_space<vmem>>, vector<4x16xf32>,
    return
  }
  func.func @transform_0(%arg0: i32) -> (i32, i32) {
    %c0_i32 = arith.constant 0 : i32
    %c0_i32_0 = arith.constant 0 : i32
    %c0_i32_1 = arith.constant 0 : i32
    return %c0_i32, %c0_i32_0 : i32, i32
  }
  func.func @transform_1(%arg0: i32) -> (i32, i32) {
    %c0_i32 = arith.constant 0 : i32
    %c0_i32_0 = arith.constant 0 : i32
    %c0_i32_1 = arith.constant 0 : i32
    return %c0_i32, %c0_i32_0 : i32, i32
  }
  func.func @transform_2(%arg0: i32) -> (i32, i32) {
    %c0_i32 = arith.constant 0 : i32
    %c0_i32_0 = arith.constant 0 : i32
    %c0_i32_1 = arith.constant 0 : i32
    return %c0_i32, %c0_i32_0 : i32, i32
  }
  func.func @transform_3(%arg0: i32) -> (i32, i32) {
    %c0_i32 = arith.constant 0 : i32
    %c0_i32_0 = arith.constant 0 : i32
    %c0_i32_1 = arith.constant 0 : i32
    return %c0_i32, %c0_i32_0 : i32, i32
  }
  func.func @transform_4(%arg0: i32) -> (i32, i32) {
    %c0_i32 = arith.constant 0 : i32
    %c0_i32_0 = arith.constant 0 : i32
    %c0_i32_1 = arith.constant 0 : i32
    return %c0_i32, %c0_i32_0 : i32, i32
  }
}

</mosaic_0001>

<bundles_post_ra>
// kernel: tpu_custom_call.1
= control target key start
LH: loop header
LB: loop body
LE: loop exit
PB: predicated region body
PF: predicated region fallthrough
CT: control target
= control target key end

     0   :  { %vm30_vm0 = vcmask 130048   ;;  %s4118_s0 = inlined_call_operand.vmem [shape: f32[32,16], index: 0, kind: input, shape index: {}]   ;;  %s4119_s1 = inlined_call_operand.vmem [shape: f32[16,66], index: 1, kind: input, shape index: {}]   ;;  %s4120_s2 = inlined_call_operand.vmem [shape: f32[1,66], index: 2, kind: input, shape index: {}]   ;;  %s4121_s3 = inlined_call_operand.vmem [shape: f32[16,16], index: 3, kind: input, shape index: {}]   ;;  %s4122_s4 = inlined_call_operand.hbm [shape: f32[4,128], index: 4, kind: output, shape index: {}]  }
   0x1   :  { %v23_v0 = vld [vmem:[%s4119_s1 + $0x8] sm:$0xff]  ;;  %v22_v1 = vld [vmem:[%s4119_s1] sm:$0xff] }
   0x2   :  { %57 = vmatpush.msra.mxu0 %v23_v0  ;;  %v3050_v2 = vld [vmem:[%s4118_s0] sm:$0xff] }
   0x3   :  { %9 = vsyncpa [#allocation3], 0  ;;  %v3057_v3 = vld [vmem:[%s4118_s0 + $0x8] sm:$0xff]  ;;  %v3064_v4 = vld [vmem:[%s4118_s0 + $0x10] sm:$0xff]  ;;  %s3006_s28 = smov 80   ;;  %s3007_s29 = smov 96  }
   0x4   :  { %58 = vmatpush.msra.mxu0 %v22_v1  ;;  %v3071_v5 = vld [vmem:[%s4118_s0 + $0x18] sm:$0xff]  ;;  %v3078_v6 = vld [vmem:[%s4120_s2] ss:$0 sm:$0xff]  ;;  %s3008_s30 = smov 112   ;;  %vm219_vm13 = vcmask 1043456   ;;  %s3012_s12 = smov 32  }
   0x5   :  { %2809 = vmatmul.msk.f32.vlgmr.msra.gmra.mxu0 %vm30_vm0, %v3050_v2  ;;  %s3013_s13 = smov 48   ;;  %s3015_s16 = smov [#allocation2]  }
   0x6   :  { %s2798_s17 = sshll.u32 %s3015_s16, 4  ;;  %s2800_s20 = sshll.u32 %s4122_s4, 4  ;;  %s2799_s17 = int_to_ptr.vmem [resolvable:$true] %s2798_s17  ;;  %s2801_s20 = int_to_ptr.hbm [resolvable:$true] %s2800_s20 }
   0xd   :  { %2810 = vmatmul.msk.f32.gmra.mxu0 %vm30_vm0, %v3057_v3 }
  0x15   :  { %2811 = vmatmul.msk.f32.gmra.mxu0 %vm30_vm0, %v3064_v4 }
  0x1d   :  { %2812 = vmatmul.msk.f32.gmra.mxu0 %vm30_vm0, %v3071_v5 }
  0x82   :  { %v60_v7 = vpop.f32.mrf.mxu0 }
  0x83   :  { %v3081_v8 = vadd.f32 %v3078_v6, %v60_v7 }
  0x85   :  { %v2817_v9 = vmul.f32 -1.442695, %v3081_v8  ;;  %280 = vrot.lane.b32.xlu2 %v3081_v8, %s3006_s28  ;;  %245 = vrot.lane.b32.xlu1 %v3081_v8, %s3007_s29  ;;  %v3094_v12 = vrot.slane %v3081_v8, 4 }
  0x86   :  { %210 = vrot.lane.b32.xlu0 %v3081_v8, %s3008_s30 }
  0x87   :  { %2960 = vpow2.f32 %v2817_v9 }
  0x8a   :  { %v63_v10 = vpop.f32.mrf.mxu0 }
  0x8b   :  { %v3091_v11 = vadd.f32 %v3078_v6, %v63_v10 }
  0x8d   :  { %v2961_v13 = vpop.eup %2960  ;;  %v2818_v14 = vmul.f32 -1.442695, %v3091_v11  ;;  %380 = vrot.lane.b32.xlu1 %v3094_v12, %s3007_s29  ;;  %347 = vrot.lane.b32.xlu2 %v3094_v12, %s3008_s30  ;;  %v3104_v17 = vrot.slane %v3091_v11, 4 }
  0x8e   :  { %v113_v15 = vadd.f32 1.0, %v2961_v13  ;;  %481 = vrot.lane.b32.xlu0 %v3091_v11, %s3008_s30 }
  0x8f   :  { %2962 = vpow2.f32 %v2818_v14 }
  0x90   :  { %2964 = vrcp.f32 %v113_v15  ;;  %v128_v25 = vand.u32 2147483648, %v113_v15  ;;  %v126_v27 = vand.u32 2147483647, %v113_v15  ;;  %vm122_vm2 = vweird.f32 %v113_v15 }
  0x92   :  { %v66_v16 = vpop.f32.mrf.mxu0  ;;  %v129_v30 = vor.u32 1.1754944e-38, %v128_v25  ;;  %vm127_vm4 = vcmp.eq.f32.partialorder %v126_v27, 8.507059e+37 }
  0x93   :  { %v3107_v18 = vadd.f32 %v3078_v6, %v66_v16 }
  0x95   :  { %v2963_v19 = vpop.eup %2962  ;;  %415 = vrot.lane.b32.xlu1 %v3094_v12, %s3006_s28  ;;  %549 = vrot.lane.b32.xlu2 %v3091_v11, %s3006_s28  ;;  %v2819_v23 = vmul.f32 -1.442695, %v3107_v18  ;;  %v3126_v35 = vrot.slane %v3107_v18, 4 }
  0x96   :  { %v2965_v20 = vpop.eup %2964  ;;  %v114_v21 = vadd.f32 1.0, %v2963_v19  ;;  %649 = vrot.lane.b32.xlu0 %v3104_v17, %s3007_s29 }
  0x97   :  { %v118_v22 = vmul.f32 %v2965_v20, %v113_v15  ;;  %vm123_vm1 = vweird.f32 %v2965_v20 }
  0x98   :  { %2966 = vrcp.f32 %v114_v21  ;;  %vm124_vm3 = vmor %vm122_vm2, %vm123_vm1  ;;  %vm137_vm5 = vweird.f32 %v114_v21  ;;  %v141_v44 = vand.u32 2147483647, %v114_v21  ;;  %v143_v45 = vand.u32 2147483648, %v114_v21 }
  0x99   :  { %v119_v24 = vsub.f32 1.0, %v118_v22  ;;  %2968 = vpow2.f32 %v2819_v23  ;;  %v26_v22 = vld [vmem:[%s4121_s3 + $0x8] sm:$0xff]  ;;  %v25_v23 = vld [vmem:[%s4121_s3] sm:$0xff]  ;;  %s3011_s3 = smov 16  }
  0x9a   :  { %v69_v47 = vpop.f32.mrf.mxu0  ;;  %vm142_vm8 = vcmp.eq.f32.partialorder %v141_v44, 8.507059e+37  ;;  %v144_v49 = vor.u32 1.1754944e-38, %v143_v45  ;;  %86 = vmatpush.msra.mxu1 %v26_v22 }
  0x9b   :  { %v120_v26 = vmul.f32 %v2965_v20, %v119_v24  ;;  %v3148_v50 = vadd.f32 %v3078_v6, %v69_v47 }
  0x9c   :  { %87 = vmatpush.msra.mxu1 %v25_v23 }
  0x9d   :  { %v121_v28 = vadd.f32 %v2965_v20, %v120_v26  ;;  %514 = vrot.lane.b32.xlu1 %v3091_v11, %s3007_s29  ;;  %684 = vrot.lane.b32.xlu2 %v3104_v17, %s3006_s28  ;;  %v2820_v25 = vmul.f32 -1.442695, %v3148_v50 }
  0x9e   :  { %v2967_v29 = vpop.eup %2966  ;;  %750 = vrot.lane.b32.xlu0 %v3107_v18, %s3008_s30  ;;  %2813 = vmatmul.msk.f32.vlgmr.msra.gmra.mxu1 %vm30_vm0, %v3050_v2 }
  0x9f   :  { %v125_v31 = vsel %vm124_vm3, %v2965_v20, %v121_v28  ;;  %v133_v32 = vmul.f32 %v2967_v29, %v114_v21  ;;  %v2969_v34 = vpop.eup %2968  ;;  %vm138_vm6 = vweird.f32 %v2967_v29  ;;  %vm212_vm3 = vcmask 31744  }
  0xa0   :  { %v3122_v33 = vsel %vm127_vm4, %v129_v30, %v125_v31  ;;  %v115_v37 = vadd.f32 1.0, %v2969_v34  ;;  %vm139_vm7 = vmor %vm137_vm5, %vm138_vm6  ;;  %vm1427_vm4 = vcmask 1041409   ;;  %vm1429_vm5 = vcmask 1042434  }
  0xa1   :  { %1437 = vst [vmem:[#allocation1] sm:$0xff] %v3122_v33  ;;  %v134_v36 = vsub.f32 1.0, %v133_v32  ;;  %vm1627_vm6 = vcmask 1045509  }
  0xa2   :  { %2970 = vrcp.f32 %v115_v37  ;;  %vm152_vm9 = vweird.f32 %v115_v37  ;;  %v158_v63 = vand.u32 2147483648, %v115_v37  ;;  %v156_v1 = vand.u32 2147483647, %v115_v37 }
  0xa3   :  { %v135_v38 = vmul.f32 %v2967_v29, %v134_v36  ;;  %2972 = vpow2.f32 %v2820_v25 }
  0xa4   :  { %v159_v6 = vor.u32 1.1754944e-38, %v158_v63  ;;  %vm157_vm12 = vcmp.eq.f32.partialorder %v156_v1, 8.507059e+37 }
  0xa5   :  { %616 = vrot.lane.b32.xlu1 %v3104_v17, %s3008_s30  ;;  %818 = vrot.lane.b32.xlu2 %v3107_v18, %s3006_s28  ;;  %v136_v43 = vadd.f32 %v2967_v29, %v135_v38 }
  0xa6   :  { %918 = vrot.lane.b32.xlu0 %v3126_v35, %s3007_s29  ;;  %2814 = vmatmul.msk.f32.gmra.mxu1 %vm30_vm0, %v3057_v3 }
  0xa7   :  { %v140_v48 = vsel %vm139_vm7, %v2967_v29, %v136_v43  ;;  %vm1629_vm7 = vcmask 1046534  }
  0xa8   :  { %v3134_v39 = vld [vmem:[#allocation1 + $0x5] ss:$9 sm:$0xff]  ;;  %v3138_v41 = vld [vmem:[#allocation1 + $0x7] ss:$9 sm:$0xff]  ;;  %v2971_v46 = vpop.eup %2970  ;;  %v3156_v55 = vsel %vm142_vm8, %v144_v49, %v140_v48  ;;  %vm1631_vm8 = vcmask 1047559  }
  0xa9   :  { %v3136_v40 = vld [vmem:[#allocation1 + $0x6] ss:$9 sm:$0xff]  ;;  %v3140_v42 = vld [vmem:[#allocation1 + $0x4] ss:$9 sm:$0xff]  ;;  %v148_v54 = vmul.f32 %v2971_v46, %v115_v37  ;;  %vm153_vm10 = vweird.f32 %v2971_v46  ;;  %v2973_v26 = vpop.eup %2972 }
  0xaa   :  { %1474 = vst [vmem:[#allocation1] sm:$0xff] %v3122_v33  ;;  %vm154_vm11 = vmor %vm152_vm9, %vm153_vm10  ;;  %v116_v29 = vadd.f32 1.0, %v2973_v26  ;;  %vm1431_vm9 = vcmask 1043459   ;;  %vm1435_vm10 = vcmask 125952  }
  0xab   :  { %v149_v57 = vsub.f32 1.0, %v148_v54 }
  0xac   :  { %2974 = vrcp.f32 %v116_v29  ;;  %v173_v43 = vand.u32 2147483648, %v116_v29  ;;  %vm167_vm14 = vweird.f32 %v116_v29  ;;  %v171_v45 = vand.u32 2147483647, %v116_v29 }
  0xad   :  { %783 = vrot.lane.b32.xlu1 %v3107_v18, %s3007_s29  ;;  %953 = vrot.lane.b32.xlu2 %v3126_v35, %s3006_s28  ;;  %v150_v58 = vmul.f32 %v2971_v46, %v149_v57 }
  0xae   :  { %2815 = vmatmul.msk.f32.gmra.mxu1 %vm30_vm0, %v3064_v4  ;;  %vm172_vm2 = vcmp.eq.f32.partialorder %v171_v45, 8.507059e+37 }
  0xaf   :  { %v151_v0 = vadd.f32 %v2971_v46, %v150_v58 }
  0xb1   :  { %v3150_v51 = vld [vmem:[#allocation1 + $0x6] ss:$9 sm:$0xff]  ;;  %v3154_v53 = vld [vmem:[#allocation1 + $0x4] ss:$9 sm:$0xff]  ;;  %v155_v7 = vsel %vm154_vm11, %v2971_v46, %v151_v0  ;;  %v174_v46 = vor.u32 1.1754944e-38, %v173_v43  ;;  %v1256_v43 = vrot.slane %v3122_v33, 1 }
  0xb2   :  { %v3152_v52 = vld [vmem:[#allocation1 + $0x5] ss:$9 sm:$0xff]  ;;  %v3158_v56 = vld [vmem:[#allocation1 + $0x7] ss:$9 sm:$0xff]  ;;  %v3180_v15 = vsel %vm157_vm12, %v159_v6, %v155_v7  ;;  %v2975_v31 = vpop.eup %2974  ;;  %vm1639_vm11 = vcmask 261252   ;;  %vm1822_vm12 = vcmask 388352  }
  0xb3   :  { %1824 = vst [vmem:[#allocation1] sm:$0xff] %v3156_v55  ;;  %v163_v32 = vmul.f32 %v2975_v31, %v116_v29  ;;  %vm168_vm15 = vweird.f32 %v2975_v31 }
  0xb4   :  { %vm169_vm1 = vmor %vm167_vm14, %vm168_vm15  ;;  %vm2206_vm14 = vcmask 650752   ;;  %vm2407_vm15 = vcmask 786052  }
  0xb5   :  { %1052 = vrot.lane.b32.xlu2 %v3148_v50, %s3007_s29  ;;  %v164_v37 = vsub.f32 1.0, %v163_v32 }
  0xb6   :  { %2816 = vmatmul.msk.f32.gmra.mxu1 %vm30_vm0, %v3071_v5 }
  0xb7   :  { %v165_v38 = vmul.f32 %v2975_v31, %v164_v37 }
  0xba   :  { %v3163_v59 = vld [vmem:[#allocation1 + $0x4] ss:$9 sm:$0xff]  ;;  %v3165_v60 = vld [vmem:[#allocation1 + $0x6] ss:$9 sm:$0xff] }
  0xbb   :  { %v3167_v61 = vld [vmem:[#allocation1 + $0x5] ss:$9 sm:$0xff]  ;;  %v3169_v62 = vld [vmem:[#allocation1 + $0x7] ss:$9 sm:$0xff] }
  0xbc   :  { %1861 = vst [vmem:[#allocation1] sm:$0xff] %v3156_v55 }
  0xc3   :  { %v3172_v9 = vld [vmem:[#allocation1 + $0x4] ss:$9 sm:$0xff]  ;;  %v3174_v10 = vld [vmem:[#allocation1 + $0x7] ss:$9 sm:$0xff] }
  0xc4   :  { %v3176_v13 = vld [vmem:[#allocation1 + $0x6] ss:$9 sm:$0xff] }
  0xc5   :  { %v3178_v14 = vld [vmem:[#allocation1 + $0x5] ss:$9 sm:$0xff] }
  0xc6   :  { %2208 = vst [vmem:[#allocation1] sm:$0xff] %v3180_v15 }
  0xc8   :  { %177 = vxpose.xlu0.b32.start.end [1/1] (short) (narrow) %v3081_v8, 16 }
  0xcd   :  { %v3184_v16 = vld [vmem:[#allocation1 + $0x4] ss:$9 sm:$0xff]  ;;  %v3186_v19 = vld [vmem:[#allocation1 + $0x6] ss:$9 sm:$0xff] }
  0xce   :  { %4129 = vst [vmem:[#allocation5_spill] sm:$0xff] %v3186_v19  ;;  %v3188_v20 = vld [vmem:[#allocation1 + $0x7] ss:$9 sm:$0xff]  ;;  %v3190_v21 = vld [vmem:[#allocation1 + $0x5] ss:$9 sm:$0xff] }
  0xcf   :  { %2245 = vst [vmem:[#allocation1] sm:$0xff] %v3180_v15 }
  0xd6   :  { %v3222_v47 = vld [vmem:[#allocation1 + $0x4] ss:$9 sm:$0xff]  ;;  %v3224_v49 = vld [vmem:[#allocation1 + $0x7] ss:$9 sm:$0xff] }
  0xd7   :  { %4130 = vst [vmem:[#allocation6_spill] sm:$0xff] %v3222_v47  ;;  %v3226_v57 = vld [vmem:[#allocation1 + $0x5] ss:$9 sm:$0xff] }
  0xd8   :  { %4131 = vst [vmem:[#allocation7_spill] sm:$0xff] %v3224_v49  ;;  %v3228_v58 = vld [vmem:[#allocation1 + $0x6] ss:$9 sm:$0xff] }
  0xd9   :  { %4132 = vst [vmem:[#allocation8_spill] sm:$0xff] %v3226_v57 }
  0xdb   :  { %315 = vxpose.xlu2.b32.start.end [1/1] (short) (narrow) %v3094_v12, 16 }
  0xdf   :  { %v281_v8 = vpop.permute.xlu2 %280 }
  0xe0   :  { %2824 = vmatpush.msk.msra.mxu3 %vm219_vm13, %v281_v8 }
  0xe7   :  { %v348_v24 = vpop.permute.xlu2 %347 }
  0xeb   :  { %448 = vxpose.xlu2.b32.start.end [1/1] (short) (narrow) %v3091_v11, 16 }
  0xef   :  { %v3211_v12 = vpop.permute.xlu2 %549 }
  0xf7   :  { %v246_v27 = vpop.permute.xlu1 %245  ;;  %v685_v28 = vpop.permute.xlu2 %684 }
  0xf8   :  { %v211_v30 = vpop.permute.xlu0 %210  ;;  %248 = vxpose.xlu1.b32.start.end [1/1] (short) (narrow) %v246_v27, 16  ;;  %2842 = vmatpush.msk.msrb.mxu1 %vm219_vm13, %v685_v28 }
  0xf9   :  { %2821 = vmatpush.msk.msra.mxu2 %vm219_vm13, %v211_v30  ;;  %v4126_v30 = vmov 64  }
  0xfb   :  { %2827 = vmatpush.msk.msrb.mxu2 %vm219_vm13, %v348_v24  ;;  %717 = vxpose.xlu2.b32.start.end [1/1] (short) (narrow) %v3107_v18, 16  ;;  %v166_v18 = vadd.f32 %v2975_v31, %v165_v38  ;;  %v3241_v24 = vrot.slane %v3148_v50, 4 }
  0xfd   :  { %v170_v48 = vsel %vm169_vm1, %v2975_v31, %v166_v18  ;;  %v1540_v18 = vperm.slane %v3050_v2, 5  ;;  %vm2791_vm1 = vcmask 1048452  }
  0xfe   :  { %v175_v54 = vsel %vm172_vm2, %v174_v46, %v170_v48  ;;  %v1257_v46 = vrot.slane %v3122_v33, 2 }
  0xff   :  { %v381_v4 = vpop.permute.xlu1 %380  ;;  %v3217_v5 = vpop.permute.xlu2 %818  ;;  %2592 = vst [vmem:[#allocation1] sm:$0xff] %v175_v54 }
 0x100   :  { %383 = vxpose.xlu0.b32.start.end [1/1] (short) (narrow) %v381_v4, 16  ;;  %v482_v11 = vpop.permute.xlu0 %481 }
 0x106   :  { %v3230_v6 = vld [vmem:[#allocation1 + $0x5] ss:$9 sm:$0xff]  ;;  %v3234_v22 = vld [vmem:[#allocation1 + $0x7] ss:$9 sm:$0xff] }
 0x107   :  { %v416_v34 = vpop.permute.xlu1 %415  ;;  %v954_v36 = vpop.permute.xlu2 %953  ;;  %4133 = vst [vmem:[#allocation9_spill] sm:$0xff] %v3230_v6  ;;  %v3232_v7 = vld [vmem:[#allocation1 + $0x6] ss:$9 sm:$0xff]  ;;  %v3237_v23 = vld [vmem:[#allocation1 + $0x4] ss:$9 sm:$0xff] }
 0x108   :  { %2830 = vmatpush.msk.msrb.mxu3 %vm219_vm13, %v416_v34  ;;  %2854 = vmatpush.msk.msra.mxu1 %vm219_vm13, %v954_v36  ;;  %v650_v44 = vpop.permute.xlu0 %649  ;;  %4134 = vst [vmem:[#allocation10_spill] sm:$0xff] %v3232_v7  ;;  %v1447_v34 = vperm.slane %v3134_v39, 0 }
 0x109   :  { %4135 = vst [vmem:[#allocation11_spill] sm:$0xff] %v3234_v22 }
 0x10a   :  { %4136 = vst [vmem:[#allocation12_spill] sm:$0xff] %v3237_v23 }
 0x10b   :  { %986 = vxpose.xlu2.b32.start.end [1/1] (short) (narrow) %v3148_v50, 16  ;;  %2629 = vst [vmem:[#allocation1] sm:$0xff] %v175_v54  ;;  %v1261_v54 = vperm.slane %v1257_v46, 0 }
 0x10f   :  { %v515_v63 = vpop.permute.xlu1 %514  ;;  %v1053_v26 = vpop.permute.xlu2 %1052 }
 0x110   :  { %652 = vxpose.xlu0.b32.start.end [1/1] (short) (narrow) %v650_v44, 16  ;;  %517 = vxpose.xlu1.b32.start.end [1/1] (short) (narrow) %v515_v63, 16  ;;  %v751_v0 = vpop.permute.xlu0 %750 }
 0x117   :  { %v617_v1 = vpop.permute.xlu1 %616 }
 0x118   :  { %2839 = vmatpush.msk.msrb.mxu0 %vm219_vm13, %v617_v1  ;;  %v919_v8 = vpop.permute.xlu0 %918 }
 0x11f   :  { %v784_v25 = vpop.permute.xlu1 %783 }
 0x120   :  { %921 = vxpose.xlu0.b32.start.end [1/1] (short) (narrow) %v919_v8, 16  ;;  %584 = vxpose.xlu1.b32.start.end [1/1] (short) (narrow) %v3104_v17, 16  ;;  %v1485_v8 = vperm.slane %v3150_v51, 0 }
 0x130   :  { %1122 = vxpose.xlu0.b32.start.end [1/1] (short) (narrow) %v3241_v24, 16  ;;  %786 = vxpose.xlu1.b32.start.end [1/1] (short) (narrow) %v784_v25, 16  ;;  %v4124_v25 = vmov 65  }
 0x140   :  { %853 = vxpose.xlu1.b32.start.end [1/1] (short) (narrow) %v3126_v35, 16 }
 0x150   :  { %1055 = vxpose.xlu1.b32.start.end [1/1] (short) (narrow) %v1053_v26, 16 }
 0x16c   :  { %v193_v27 = vpop.trf.xlu0 }
 0x16d   :  { %2822 = vmatmul.msk.f32.vlgmr.msra.gmra.mxu2 %vm212_vm3, %v193_v27 }
 0x16e   :  { %2833 = vmatpush.msk.msra.mxu2 %vm219_vm13, %v482_v11 }
 0x174   :  { %v194_v28 = vpop.trf.xlu0  ;;  %v331_v17 = vpop.trf.xlu2 }
 0x175   :  { %2823 = vmatmul.msk.f32.gmra.mxu2 %vm212_vm3, %v194_v28 }
 0x17c   :  { %v332_v29 = vpop.trf.xlu2 }
 0x17d   :  { %2828 = vmatmul.msk.f32.vlgmr.msrb.gmra.mxu2 %vm212_vm3, %v331_v17  ;;  %v1259_v17 = vperm.slane %v3122_v33, 0 }
 0x17e   :  { %2845 = vmatpush.msk.msrb.mxu2 %vm219_vm13, %v751_v0  ;;  %v1258_v0 = vrot.slane %v3122_v33, 3 }
 0x180   :  { %v1262_v26 = vperm.slane %v1258_v0, 0 }
 0x184   :  { %v464_v51 = vpop.trf.xlu2 }
 0x185   :  { %2829 = vmatmul.msk.f32.gmra.mxu2 %vm212_vm3, %v332_v29 }
 0x18d   :  { %2834 = vmatmul.msk.f32.vlgmr.msra.gmra.mxu2 %vm212_vm3, %v464_v51 }
 0x197   :  { %2888 = vset.pattern.permute.xlu0 %v4126_v30 }
 0x19c   :  { %v264_v4 = vpop.trf.xlu1 }
 0x19d   :  { %2825 = vmatmul.msk.f32.vlgmr.msra.gmra.mxu3 %vm212_vm3, %v264_v4 }
 0x19e   :  { %2836 = vmatpush.msk.msra.mxu3 %vm219_vm13, %v3211_v12  ;;  %v1328_v12 = vlaneseq }
 0x1a0   :  { %v3268_v37 = vshrl.u32 %v1328_v12, 7 }
 0x1a3   :  { %2881 = vset.pattern.permute.xlu1 %v4126_v30 }
 0x1a4   :  { %v265_v11 = vpop.trf.xlu1  ;;  %v399_v31 = vpop.trf.xlu0 }
 0x1a5   :  { %2826 = vmatmul.msk.f32.gmra.mxu3 %vm212_vm3, %v265_v11 }
 0x1a6   :  { %1019 = vrot.lane.b32.xlu0 %v3148_v50, %s3008_s30 }
 0x1ac   :  { %v400_v32 = vpop.trf.xlu0 }
 0x1ad   :  { %2831 = vmatmul.msk.f32.vlgmr.msrb.gmra.mxu3 %vm212_vm3, %v399_v31  ;;  %v1327_v31 = vperm.slane %v3050_v2, 0 }
 0x1ae   :  { %2848 = vmatpush.msk.msrb.mxu3 %vm219_vm13, %v3217_v5  ;;  %1187 = vrot.lane.b32.xlu0 %v3241_v24, %s3007_s29  ;;  %v3273_v5 = vadd.s32 8, %v3268_v37 }
 0x1b2   :  { %885 = vrot.lane.b32.xlu1 %v3126_v35, %s3008_s30  ;;  %v1340_v35 = vperm.slane %v3050_v2, 1 }
 0x1b4   :  { %v533_v36 = vpop.trf.xlu1  ;;  %v668_v39 = vpop.trf.xlu0 }
 0x1b5   :  { %2832 = vmatmul.msk.f32.gmra.mxu3 %vm212_vm3, %v400_v32  ;;  %2843 = vmatmul.msk.f32.vlgmr.msrb.gmra.mxu1 %vm212_vm3, %v668_v39 }
 0x1b6   :  { %1455 = vperm.xlu0 %2888, %v1447_v34  }
 0x1ba   :  { %1087 = vrot.lane.b32.xlu1 %v3148_v50, %s3006_s28  ;;  %v1260_v50 = vperm.slane %v1256_v43, 0 }
 0x1bc   :  { %v534_v38 = vpop.trf.xlu1  ;;  %v669_v45 = vpop.trf.xlu0 }
 0x1bd   :  { %2837 = vmatmul.msk.f32.vlgmr.msra.gmra.mxu3 %vm212_vm3, %v533_v36  ;;  %2844 = vmatmul.msk.f32.gmra.mxu1 %vm212_vm3, %v669_v45 }
 0x1be   :  { %2889 = vset.pattern.permute.xlu0 %v3273_v5 }
 0x1c2   :  { %1222 = vrot.lane.b32.xlu1 %v3241_v24, %s3006_s28 }
 0x1c4   :  { %v600_v44 = vpop.trf.xlu1  ;;  %v937_v63 = vpop.trf.xlu0 }
 0x1c5   :  { %2838 = vmatmul.msk.f32.gmra.mxu3 %vm212_vm3, %v534_v38  ;;  %2840 = vmatmul.msk.f32.vlgmr.msrb.gmra.mxu0 %vm212_vm3, %v600_v44  ;;  %v1353_v44 = vperm.slane %v3050_v2, 2 }
 0x1c6   :  { %1351 = vperm.xlu0 %2889, %v1340_v35   ;;  %2855 = vmatmul.msk.f32.vlgmr.msra.gmra.mxu1 %vm212_vm3, %v937_v63  ;;  %v1449_v63 = vperm.slane %v3138_v41, 0 }
 0x1ca   :  { %1268 = vperm.xlu1 %2881, %v1260_v50  }
 0x1cc   :  { %v601_v48 = vpop.trf.xlu1  ;;  %v938_v27 = vpop.trf.xlu0 }
 0x1cd   :  { %2841 = vmatmul.msk.f32.gmra.mxu0 %vm212_vm3, %v601_v48  ;;  %v1446_v48 = vperm.slane %v3140_v42, 0  ;;  %v1527_v42 = vperm.slane %v3050_v2, 4 }
 0x1ce   :  { %1551 = vperm.xlu0 %2889, %v1540_v18   ;;  %2856 = vmatmul.msk.f32.gmra.mxu1 %vm212_vm3, %v938_v27 }
 0x1d2   :  { %1272 = vperm.xlu1 %2881, %v1261_v54  }
 0x1d4   :  { %v802_v1 = vpop.trf.xlu1  ;;  %v3303_v4 = vpop.trf.xlu0 }
 0x1d5   :  { %2849 = vmatmul.msk.f32.vlgmr.msrb.gmra.mxu3 %vm212_vm3, %v802_v1  ;;  %v1484_v1 = vperm.slane %v3152_v52, 0 }
 0x1d6   :  { %2894 = vset.pattern.permute.xlu0 %v4124_v25 }
 0x1d7   :  { %1496 = vperm.xlu0 %2894, %v1485_v8   ;;  %v465_v8 = vpop.trf.xlu2 }
 0x1d8   :  { %2835 = vmatmul.msk.f32.gmra.mxu2 %vm212_vm3, %v465_v8 }
 0x1da   :  { %1276 = vperm.xlu1 %2881, %v1262_v26  }
 0x1dc   :  { %v803_v28 = vpop.trf.xlu1  ;;  %v3306_v12 = vpop.trf.xlu0 }
 0x1dd   :  { %2850 = vmatmul.msk.f32.gmra.mxu3 %vm212_vm3, %v803_v28  ;;  %v1553_v28 = vperm.slane %v3050_v2, 6 }
 0x1e2   :  { %2882 = vset.pattern.permute.xlu1 %v4124_v25 }
 0x1e3   :  { %1288 = vperm.xlu1 %2882, %v1259_v17  }
 0x1e4   :  { %v869_v29 = vpop.trf.xlu1 }
 0x1eb   :  { %1292 = vperm.xlu1 %2882, %v1260_v50  }
 0x1ec   :  { %v870_v11 = vpop.trf.xlu1 }
 0x1f3   :  { %1296 = vperm.xlu1 %2882, %v1261_v54  }
 0x1f4   :  { %v1071_v32 = vpop.trf.xlu1 }
 0x1fb   :  { %1300 = vperm.xlu1 %2882, %v1262_v26  }
 0x1fc   :  { %v1072_v36 = vpop.trf.xlu1 }
 0x203   :  { %2883 = vset.pattern.permute.xlu1 %v3268_v37 }
 0x20b   :  { %1332 = vperm.xlu1 %2883, %v1327_v31  }
 0x213   :  { %2884 = vset.pattern.permute.xlu1 %v3273_v5 }
 0x218   :  { %v1020_v34 = vpop.permute.xlu0 %1019 }
 0x219   :  { %2857 = vmatpush.msk.msra.mxu2 %vm219_vm13, %v1020_v34 }
 0x21b   :  { %1338 = vperm.xlu1 %2884, %v1327_v31  }
 0x220   :  { %v1188_v38 = vpop.permute.xlu0 %1187  ;;  %v3347_v27 = vpop.f32.mrf.mxu3 }
 0x221   :  { %1190 = vxpose.xlu2.b32.start.end [1/1] (short) (narrow) %v1188_v38, 16 }
 0x223   :  { %2885 = vset.pattern.permute.xlu1 %v3268_v37 }
 0x224   :  { %v886_v39 = vpop.permute.xlu1 %885 }
 0x225   :  { %2851 = vmatpush.msk.msra.mxu0 %vm219_vm13, %v886_v39 }
 0x226   :  { %2852 = vmatmul.msk.f32.vlgmr.msra.gmra.mxu0 %vm212_vm3, %v869_v29  ;;  %v3352_v29 = vpop.f32.mrf.mxu2 }
 0x228   :  { %v3355_v31 = vpop.permute.xlu0 %1455 }
 0x22b   :  { %1345 = vperm.xlu1 %2885, %v1340_v35   ;;  %v4123_v35 = vperm.slane %v3050_v2, 3 }
 0x22c   :  { %v1088_v43 = vpop.permute.xlu1 %1087 }
 0x22d   :  { %2860 = vmatpush.msk.msra.mxu3 %vm219_vm13, %v1088_v43 }
 0x22e   :  { %2853 = vmatmul.msk.f32.gmra.mxu0 %vm212_vm3, %v870_v11  ;;  %2861 = vmatmul.msk.f32.vlgmr.msra.gmra.mxu3 %vm212_vm3, %v1071_v32  ;;  %v1566_v11 = vperm.slane %v3050_v2, 7 }
 0x233   :  { %1358 = vperm.xlu1 %2885, %v1353_v44  }
 0x234   :  { %v1223_v50 = vpop.permute.xlu1 %1222 }
 0x235   :  { %2866 = vmatpush.msk.msrb.mxu1 %vm219_vm13, %v1223_v50 }
 0x236   :  { %2862 = vmatmul.msk.f32.gmra.mxu3 %vm212_vm3, %v1072_v36  ;;  %v3364_v36 = vpop.f32.mrf.mxu2 }
 0x23b   :  { %2886 = vset.pattern.permute.xlu1 %v3273_v5 }
 0x23c   :  { %v1269_v45 = vpop.permute.xlu1 %1268 }
 0x23d   :  { %v1282_v38 = vmul.f32 %v1269_v45, %v3364_v36  ;;  %v1281_v50 = vmul.f32 %v1269_v45, %v3352_v29  ;;  %v1448_v45 = vperm.slane %v3136_v40, 0 }
 0x243   :  { %1364 = vperm.xlu1 %2886, %v1353_v44   ;;  %v1642_v44 = vrot.slane %v3156_v55, 1 }
 0x244   :  { %v3323_v46 = vpop.permute.xlu1 %1272 }
 0x24b   :  { %1377 = vperm.xlu1 %2886, %v4123_v35  }
 0x24c   :  { %v3327_v54 = vpop.permute.xlu1 %1276 }
 0x253   :  { %2887 = vset.pattern.permute.xlu1 %v4126_v30 }
 0x254   :  { %1451 = vperm.xlu1 %2887, %v1446_v48  }
 0x255   :  { %v3330_v0 = vpop.permute.xlu1 %1288 }
 0x25c   :  { %1463 = vperm.xlu1 %2887, %v1449_v63  }
 0x25d   :  { %v1293_v26 = vpop.permute.xlu1 %1292 }
 0x25e   :  { %v1305_v39 = vmul.f32 %v1293_v26, %v3347_v27 }
 0x260   :  { %v3375_v63 = vsub.f32 %v1281_v50, %v1305_v39  ;;  %v1645_v39 = vperm.slane %v3156_v55, 0  ;;  %v1483_v50 = vperm.slane %v3154_v53, 0  ;;  %v1713_v53 = vperm.slane %v3057_v3, 0 }
 0x264   :  { %2891 = vset.pattern.permute.xlu1 %v4124_v25 }
 0x265   :  { %1492 = vperm.xlu1 %2891, %v1484_v1   ;;  %v3339_v41 = vpop.permute.xlu1 %1296  ;;  %v3377_v1 = vperm.slane %v1642_v44, 0 }
 0x26d   :  { %2892 = vset.pattern.permute.xlu1 %v3268_v37  ;;  %v3343_v52 = vpop.permute.xlu1 %1300 }
 0x275   :  { %1532 = vperm.xlu1 %2892, %v1527_v42  }
 0x27d   :  { %1545 = vperm.xlu1 %2892, %v1540_v18   ;;  %v3350_v51 = vpop.permute.xlu1 %1332  ;;  %v3359_v18 = vpop.f32.mrf.mxu3 }
 0x27e   :  { %v1306_v34 = vmul.f32 %v1293_v26, %v3359_v18 }
 0x280   :  { %v3368_v43 = vsub.f32 %v1282_v38, %v1306_v34  ;;  %v733_v34 = vpop.trf.xlu2 }
 0x281   :  { %2846 = vmatmul.msk.f32.vlgmr.msrb.gmra.mxu2 %vm212_vm3, %v733_v34 }
 0x283   :  { %2880 = vset.pattern.permute.xlu2 %v4126_v30 }
 0x285   :  { %2896 = vset.pattern.permute.xlu1 %v3273_v5 }
 0x288   :  { %v734_v44 = vpop.trf.xlu2 }
 0x289   :  { %2847 = vmatmul.msk.f32.gmra.mxu2 %vm212_vm3, %v734_v44  ;;  %v1307_v44 = vmul.f32 %v3339_v41, %v3347_v27 }
 0x28d   :  { %1564 = vperm.xlu1 %2896, %v1553_v28   ;;  %v3361_v32 = vpop.permute.xlu1 %1338 }
 0x290   :  { %v1002_v40 = vpop.trf.xlu2 }
 0x291   :  { %2858 = vmatmul.msk.f32.vlgmr.msra.gmra.mxu2 %vm212_vm3, %v1002_v40 }
 0x292   :  { %1154 = vrot.lane.b32.xlu2 %v3241_v24, %s3008_s30  ;;  %v1352_v24 = vpop.permute.xlu0 %1351 }
 0x293   :  { %v1382_v48 = vmul.f32 %v1352_v24, %v3368_v43  ;;  %v1643_v24 = vrot.slane %v3156_v55, 2 }
 0x295   :  { %1577 = vperm.xlu1 %2896, %v1566_v11   ;;  %v1397_v33 = vsel %vm30_vm0, %v1382_v48, 0.0  ;;  %v3394_v48 = vperm.slane %v1643_v24, 0  ;;  %v1644_v24 = vrot.slane %v3156_v55, 3 }
 0x29a   :  { %1264 = vperm.xlu2 %2880, %v1259_v17  }
 0x29d   :  { %2898 = vset.pattern.permute.xlu1 %v4126_v30  ;;  %v1346_v8 = vpop.permute.xlu1 %1345 }
 0x29e   :  { %v1381_v26 = vmul.f32 %v1346_v8, %v3375_v63  ;;  %1654 = vperm.xlu1 %2898, %v3377_v1   ;;  %v1486_v8 = vperm.slane %v3158_v56, 0  ;;  %v1726_v56 = vperm.slane %v3057_v3, 1 }
 0x2a0   :  { %v1396_v17 = vsel %vm30_vm0, %v1381_v26, 0.0  ;;  %v1003_v26 = vpop.trf.xlu2 }
 0x2a1   :  { %v3386_v38 = vadd.f32 %v1397_v33, %v1396_v17  ;;  %2859 = vmatmul.msk.f32.gmra.mxu2 %vm212_vm3, %v1003_v26  ;;  %v3429_v26 = vperm.slane %v1644_v24, 0 }
 0x2a2   :  { %1459 = vperm.xlu2 %2880, %v1448_v45   ;;  %v1284_v45 = vmul.f32 %v3323_v46, %v3364_v36 }
 0x2a5   :  { %v1359_v17 = vpop.permute.xlu1 %1358 }
 0x2a6   :  { %2899 = vset.pattern.permute.xlu1 %v4124_v25 }
 0x2a7   :  { %1674 = vperm.xlu1 %2899, %v1645_v39  }
 0x2aa   :  { %2890 = vset.pattern.permute.xlu2 %v4124_v25 }
 0x2ab   :  { %1488 = vperm.xlu2 %2890, %v1483_v50  }
 0x2af   :  { %1682 = vperm.xlu1 %2899, %v3394_v48  }
 0x2b3   :  { %1500 = vperm.xlu2 %2890, %v1486_v8  }
 0x2b5   :  { %v1365_v50 = vpop.permute.xlu1 %1364 }
 0x2b7   :  { %2903 = vset.pattern.permute.xlu1 %v3273_v5 }
 0x2ba   :  { %v1206_v34 = vpop.trf.xlu2 }
 0x2bb   :  { %2893 = vset.pattern.permute.xlu2 %v3273_v5  ;;  %2867 = vmatmul.msk.f32.vlgmr.msrb.gmra.mxu1 %vm212_vm3, %v1206_v34 }
 0x2bf   :  { %1724 = vperm.xlu1 %2903, %v1713_v53  }
 0x2c2   :  { %v1207_v33 = vpop.trf.xlu2 }
 0x2c3   :  { %1538 = vperm.xlu2 %2893, %v1527_v42   ;;  %2868 = vmatmul.msk.f32.gmra.mxu1 %vm212_vm3, %v1207_v33  ;;  %v1308_v42 = vmul.f32 %v3339_v41, %v3359_v18  ;;  %v3438_v41 = vpop.permute.xlu1 %1377 }
 0x2c7   :  { %1737 = vperm.xlu1 %2903, %v1726_v56  }
 0x2cb   :  { %2895 = vset.pattern.permute.xlu2 %v3268_v37 }
 0x2cf   :  { %2906 = vset.pattern.permute.xlu1 %v3268_v37 }
 0x2d3   :  { %1558 = vperm.xlu2 %2895, %v1553_v28   ;;  %v1283_v28 = vmul.f32 %v3323_v46, %v3352_v29 }
 0x2d5   :  { %v3426_v40 = vsub.f32 %v1283_v28, %v1307_v44  ;;  %v1304_v44 = vmul.f32 %v3330_v0, %v3359_v18 }
 0x2db   :  { %1571 = vperm.xlu2 %2895, %v1566_v11   ;;  %v3424_v11 = vsub.f32 %v1284_v45, %v1308_v42  ;;  %v1303_v42 = vmul.f32 %v3330_v0, %v3347_v27 }
 0x2dd   :  { %v1384_v8 = vmul.f32 %v1365_v50, %v3424_v11 }
 0x2df   :  { %v1406_v55 = vsel %vm30_vm0, %v1384_v8, 0.0 }
 0x2e3   :  { %2897 = vset.pattern.permute.xlu2 %v4126_v30 }
 0x2e4   :  { %1650 = vperm.xlu2 %2897, %v1645_v39   ;;  %v1383_v39 = vmul.f32 %v1359_v17, %v3426_v40  ;;  %v1399_v17 = vrot.slane %v3386_v38, 4 }
 0x2e6   :  { %v1405_v46 = vsel %vm30_vm0, %v1383_v39, 0.0  ;;  %v1400_v39 = vadd.f32 %v1399_v17, %v3386_v38 }
 0x2e7   :  { %v1407_v33 = vadd.f32 %v1406_v55, %v1405_v46  ;;  %v1452_v46 = vpop.permute.xlu1 %1451 }
 0x2e8   :  { %v1401_v35 = vrot.slane %v1400_v39, 2 }
 0x2e9   :  { %v1408_v50 = vrot.slane %v1407_v33, 4 }
 0x2ec   :  { %v1155_v34 = vpop.permute.xlu2 %1154  ;;  %1662 = vperm.xlu2 %2897, %v3429_v26  }
 0x2ed   :  { %2863 = vmatpush.msk.msrb.mxu0 %vm219_vm13, %v1155_v34  ;;  %v1409_v34 = vadd.f32 %v1408_v50, %v1407_v33  ;;  %vm2023_vm13 = vcmask 523652  }
 0x2ee   :  { %2864 = vmatmul.msk.f32.vlgmr.msrb.gmra.mxu0 %vm212_vm3, %v3303_v4 }
 0x2f4   :  { %2900 = vset.pattern.permute.xlu2 %v4124_v25  ;;  %v1265_v45 = vpop.permute.xlu2 %1264 }
 0x2f5   :  { %v1279_v24 = vmul.f32 %v1265_v45, %v3352_v29  ;;  %v1280_v4 = vmul.f32 %v1265_v45, %v3364_v36  ;;  %1678 = vperm.xlu2 %2900, %v3377_v1  }
 0x2f6   :  { %2865 = vmatmul.msk.f32.gmra.mxu0 %vm212_vm3, %v3306_v12 }
 0x2f7   :  { %v3451_v28 = vsub.f32 %v1279_v24, %v1303_v42  ;;  %v3453_v8 = vsub.f32 %v1280_v4, %v1304_v44  ;;  %v1410_v42 = vrot.slane %v1409_v34, 2  ;;  %v1402_v24 = vadd.f32 %v1401_v35, %v1400_v39  ;;  %v3463_v4 = vpop.permute.xlu1 %1463 }
 0x2f9   :  { %v1379_v0 = vmul.f32 %v3350_v51, %v3451_v28  ;;  %v1380_v55 = vmul.f32 %v3361_v32, %v3453_v8  ;;  %v1411_v33 = vadd.f32 %v1410_v42, %v1409_v34  ;;  %v1403_v51 = vrot.slane %v1402_v24, 1 }
 0x2fb   :  { %v1387_v45 = vsel %vm30_vm0, %v1379_v0, 0.0  ;;  %v1388_v1 = vsel %vm30_vm0, %v1380_v55, 0.0  ;;  %v1412_v25 = vrot.slane %v1411_v33, 1  ;;  %v1752_v0 = vperm.slane %v3057_v3, 3 }
 0x2fc   :  { %v1389_v12 = vadd.f32 %v1388_v1, %v1387_v45  ;;  %v1460_v50 = vpop.permute.xlu2 %1459  ;;  %v1404_v45 = vadd.f32 %v1403_v51, %v1402_v24 }
 0x2fd   :  { %2902 = vset.pattern.permute.xlu2 %v3268_v37  ;;  %1757 = vperm.xlu1 %2906, %v1752_v0   ;;  %v1413_v35 = vadd.f32 %v1412_v25, %v1411_v33 }
 0x2fe   :  { %v1390_v44 = vrot.slane %v1389_v12, 4 }
 0x300   :  { %v1391_v38 = vadd.f32 %v1390_v44, %v1389_v12  ;;  %v442_v12 = vpop.f32.mrf.mxu3  ;;  %v374_v44 = vpop.f32.mrf.mxu2 }
 0x302   :  { %v1392_v17 = vrot.slane %v1391_v38, 2 }
 0x304   :  { %v1393_v32 = vadd.f32 %v1392_v17, %v1391_v38  ;;  %v1552_v38 = vpop.permute.xlu0 %1551 }
 0x305   :  { %1718 = vperm.xlu2 %2902, %v1713_v53   ;;  %v1489_v42 = vpop.permute.xlu2 %1488  ;;  %v1493_v53 = vpop.permute.xlu1 %1492  ;;  %2908 = vset.pattern.permute.xlu1 %v4126_v30 }
 0x306   :  { %v1394_v55 = vrot.slane %v1393_v32, 1  ;;  %v1503_v33 = vmul.f32 %v1489_v42, %v442_v12 }
 0x308   :  { %v1395_v1 = vadd.f32 %v1394_v55, %v1393_v32  ;;  %v445_v17 = vpop.f32.mrf.mxu3  ;;  %v377_v32 = vpop.f32.mrf.mxu2  ;;  %v1505_v55 = vmul.f32 %v1493_v53, %v442_v12 }
 0x309   :  { %v1504_v51 = vmul.f32 %v1489_v42, %v445_v17  ;;  %v1469_v22 = vmul.f32 %v3355_v31, %v377_v32  ;;  %v1471_v23 = vmul.f32 %v1460_v50, %v377_v32 }
 0x30a   :  { %v1428_v39 = vsel %vm1427_vm4, %v1404_v45, %v1395_v1  ;;  %v1739_v45 = vperm.slane %v3057_v3, 2  ;;  %v1466_v1 = vmul.f32 %v1452_v46, %v374_v44 }
 0x30b   :  { %v3470_v34 = vsel %vm1429_vm5, %v1413_v35, %v1428_v39  ;;  %v1467_v35 = vmul.f32 %v1452_v46, %v377_v32  ;;  %v1506_v39 = vmul.f32 %v1493_v53, %v445_v17 }
 0x30c   :  { %v1511_v30 = vsub.f32 %v1466_v1, %v1503_v33  ;;  %v1497_v47 = vpop.permute.xlu0 %1496 }
 0x30d   :  { %1731 = vperm.xlu2 %2902, %v1726_v56   ;;  %v1533_v24 = vpop.permute.xlu1 %1532  ;;  %v1501_v25 = vpop.permute.xlu2 %1500  ;;  %v1468_v56 = vmul.f32 %v3355_v31, %v374_v44  ;;  %v1512_v6 = vsub.f32 %v1467_v35, %v1504_v51  ;;  %v1514_v49 = vsub.f32 %v1469_v22, %v1506_v39  ;;  %v1508_v31 = vmul.f32 %v1497_v47, %v445_v17 }
 0x30e   :  { %v3482_v57 = vadd.f32 %v1511_v30, %v3451_v28  ;;  %v1507_v30 = vmul.f32 %v1497_v47, %v442_v12  ;;  %v1473_v47 = vmul.f32 %v3463_v4, %v377_v32  ;;  %v1834_v39 = vperm.slane %v3167_v61, 0 }
 0x30f   :  { %v1513_v7 = vsub.f32 %v1468_v56, %v1505_v55  ;;  %v3485_v46 = vadd.f32 %v1512_v6, %v3453_v8  ;;  %v3491_v33 = vadd.f32 %v1514_v49, %v3368_v43  ;;  %v1470_v55 = vmul.f32 %v1460_v50, %v374_v44 }
 0x310   :  { %v1516_v1 = vsub.f32 %v1471_v23, %v1508_v31  ;;  %v1579_v35 = vmul.f32 %v1533_v24, %v3482_v57  ;;  %v1510_v43 = vmul.f32 %v1501_v25, %v445_v17  ;;  %v1310_v23 = vmul.f32 %v3343_v52, %v3359_v18 }
 0x311   :  { %v3488_v53 = vadd.f32 %v1513_v7, %v3375_v63  ;;  %v1582_v6 = vmul.f32 %v1552_v38, %v3491_v33  ;;  %v1515_v63 = vsub.f32 %v1470_v55, %v1507_v30  ;;  %v1286_v38 = vmul.f32 %v3327_v54, %v3364_v36 }
 0x312   :  { %v3500_v49 = vadd.f32 %v1516_v1, %v3424_v11  ;;  %v1587_v8 = vsel %vm30_vm0, %v1579_v35, 0.0  ;;  %v1509_v17 = vmul.f32 %v1501_v25, %v442_v12  ;;  %v1518_v56 = vsub.f32 %v1473_v47, %v1510_v43 }
 0x313   :  { %v1309_v32 = vmul.f32 %v3343_v52, %v3347_v27  ;;  %v1472_v36 = vmul.f32 %v3463_v4, %v374_v44  ;;  %v1285_v12 = vmul.f32 %v3327_v54, %v3352_v29  ;;  %v1836_v29 = vperm.slane %v3169_v62, 0 }
 0x314   :  { %v1872_v62 = vperm.slane %v3176_v13, 0  ;;  %v3542_v13 = vpop.f32.mrf.mxu1 }
 0x315   :  { %2905 = vset.pattern.permute.xlu2 %v3273_v5  ;;  %v1546_v19 = vpop.permute.xlu1 %1545  ;;  %v1517_v55 = vsub.f32 %v1472_v36, %v1509_v17  ;;  %v3528_v30 = vsub.f32 %v1285_v12, %v1309_v32 }
 0x316   :  { %v1581_v22 = vmul.f32 %v1546_v19, %v3488_v53 }
 0x318   :  { %v1596_v7 = vsel %vm30_vm0, %v1581_v22, 0.0  ;;  %v3517_v22 = vsub.f32 %v1286_v38, %v1310_v23 }
 0x31a   :  { %v3525_v1 = vadd.f32 %v1518_v56, %v3517_v22 }
 0x31d   :  { %1750 = vperm.xlu2 %2905, %v1739_v45   ;;  %v1539_v42 = vpop.permute.xlu2 %1538  ;;  %v1565_v19 = vpop.permute.xlu1 %1564 }
 0x31e   :  { %v1580_v51 = vmul.f32 %v1539_v42, %v3485_v46  ;;  %v1584_v11 = vmul.f32 %v1565_v19, %v3500_v49  ;;  %v3512_v42 = vadd.f32 %v1515_v63, %v3426_v40 }
 0x320   :  { %v1588_v28 = vsel %vm30_vm0, %v1580_v51, 0.0  ;;  %v4137_v51 = vmov 64   ;;  %v1606_v40 = vsel %vm30_vm0, %v1584_v11, 0.0 }
 0x321   :  { %v1589_v50 = vadd.f32 %v1588_v28, %v1587_v8  ;;  %v3531_v28 = vadd.f32 %v1517_v55, %v3528_v30 }
 0x323   :  { %v1590_v31 = vrot.slane %v1589_v50, 4 }
 0x325   :  { %1763 = vperm.xlu2 %2905, %v1752_v0   ;;  %v1597_v0 = vsel %vm30_vm0, %v1582_v6, 0.0  ;;  %v1591_v52 = vadd.f32 %v1590_v31, %v1589_v50  ;;  %v1578_v44 = vpop.permute.xlu1 %1577 }
 0x326   :  { %v1598_v24 = vadd.f32 %v1597_v0, %v1596_v7  ;;  %v1586_v54 = vmul.f32 %v1578_v44, %v3525_v1 }
 0x327   :  { %v1592_v7 = vrot.slane %v1591_v52, 2 }
 0x328   :  { %v1599_v25 = vrot.slane %v1598_v24, 4  ;;  %v1615_v47 = vsel %vm30_vm0, %v1586_v54, 0.0  ;;  %v3556_v54 = vld [vmem:[%s4118_s0 + $0x8] sm:$0xff] }
 0x329   :  { %v1593_v0 = vadd.f32 %v1592_v7, %v1591_v52  ;;  %v1927_v3 = vperm.slane %v3556_v54, 5 }
 0x32a   :  { %v1600_v4 = vadd.f32 %v1599_v25, %v1598_v24 }
 0x32b   :  { %v1594_v17 = vrot.slane %v1593_v0, 1 }
 0x32c   :  { %v1601_v19 = vrot.slane %v1600_v4, 2 }
 0x32d   :  { %2907 = vset.pattern.permute.xlu2 %v4137_v51  ;;  %v1559_v18 = vpop.permute.xlu2 %1558  ;;  %v1655_v7 = vpop.permute.xlu1 %1654 }
 0x32e   :  { %v1583_v61 = vmul.f32 %v1559_v18, %v3512_v42  ;;  %1842 = vperm.xlu2 %2907, %v1834_v39   ;;  %v1602_v39 = vadd.f32 %v1601_v19, %v1600_v4  ;;  %v4138_v18 = vmov 65  }
 0x330   :  { %v1605_v35 = vsel %vm30_vm0, %v1583_v61, 0.0  ;;  %v1603_v32 = vrot.slane %v1602_v39, 1  ;;  %v1595_v61 = vadd.f32 %v1594_v17, %v1593_v0 }
 0x331   :  { %v1607_v27 = vadd.f32 %v1606_v40, %v1605_v35 }
 0x332   :  { %v1604_v40 = vadd.f32 %v1603_v32, %v1602_v39  ;;  %v3594_v39 = vpop.f32.mrf.mxu2 }
 0x333   :  { %v1608_v6 = vrot.slane %v1607_v27, 4 }
 0x334   :  { %v1628_v52 = vsel %vm1627_vm6, %v1604_v40, %v1595_v61  ;;  %v1667_v40 = vmul.f32 %v1655_v7, %v3594_v39 }
 0x335   :  { %v1609_v63 = vadd.f32 %v1608_v6, %v1607_v27  ;;  %v1572_v43 = vpop.permute.xlu2 %1571  ;;  %v4139_v6 = vperm.slane %v3050_v2, 3  ;;  %v1833_v2 = vperm.slane %v3163_v59, 0 }
 0x336   :  { %v1585_v8 = vmul.f32 %v1572_v43, %v3531_v28  ;;  %1850 = vperm.xlu2 %2907, %v1836_v29   ;;  %v1914_v29 = vperm.slane %v3556_v54, 4  ;;  %v1675_v43 = vpop.permute.xlu1 %1674 }
 0x337   :  { %v1610_v50 = vrot.slane %v1609_v63, 2 }
 0x338   :  { %v1614_v23 = vsel %vm30_vm0, %v1585_v8, 0.0 }
 0x339   :  { %v1616_v38 = vadd.f32 %v1615_v47, %v1614_v23  ;;  %v1611_v24 = vadd.f32 %v1610_v50, %v1609_v63  ;;  %v2028_v50 = vrot.slane %v3180_v15, 3 }
 0x33a   :  { %v3601_v32 = vpop.f32.mrf.mxu2 }
 0x33b   :  { %v1617_v11 = vrot.slane %v1616_v38, 4  ;;  %v1612_v31 = vrot.slane %v1611_v24, 1 }
 0x33d   :  { %v1618_v56 = vadd.f32 %v1617_v11, %v1616_v38  ;;  %v1613_v25 = vadd.f32 %v1612_v31, %v1611_v24  ;;  %v3590_v38 = vperm.slane %v2028_v50, 0  ;;  %v3592_v24 = vpop.f32.mrf.mxu3 }
 0x33e   :  { %2911 = vset.pattern.permute.xlu2 %v4138_v18  ;;  %v1651_v59 = vpop.permute.xlu2 %1650  ;;  %v3586_v47 = vpop.permute.xlu1 %1682 }
 0x33f   :  { %v1619_v36 = vrot.slane %v1618_v56, 2  ;;  %1883 = vperm.xlu2 %2911, %v1872_v62   ;;  %v1630_v27 = vsel %vm1629_vm7, %v1613_v25, %v1628_v52  ;;  %v1666_v25 = vmul.f32 %v1651_v59, %v3601_v32  ;;  %v1386_v52 = vmul.f32 %v3438_v41, %v3517_v22 }
 0x341   :  { %v1620_v12 = vadd.f32 %v1619_v36, %v1618_v56  ;;  %v2218_v56 = vperm.slane %v3190_v21, 0  ;;  %v1415_v22 = vsel %vm30_vm0, %v1386_v52, 0.0 }
 0x343   :  { %v1621_v55 = vrot.slane %v1620_v12, 1 }
 0x345   :  { %v1622_v35 = vadd.f32 %v1621_v55, %v1620_v12  ;;  %v3599_v31 = vpop.f32.mrf.mxu3  ;;  %v1665_v12 = vmul.f32 %v1651_v59, %v3594_v39  ;;  %v1668_v55 = vmul.f32 %v1655_v7, %v3601_v32 }
 0x346   :  { %v1663_v63 = vpop.permute.xlu2 %1662  ;;  %v1725_v11 = vpop.permute.xlu1 %1724 }
 0x347   :  { %v1632_v4 = vsel %vm1631_vm8, %v1622_v35, %v1630_v27  ;;  %2912 = vset.pattern.permute.xlu2 %v3268_v37  ;;  %v1689_v27 = vmul.f32 %v1675_v43, %v3592_v24 }
 0x348   :  { %v1634_v44 = vadd.f32 %v1632_v4, %v3542_v13  ;;  %v1690_v4 = vmul.f32 %v1675_v43, %v3599_v31 }
 0x349   :  { %v1697_v7 = vsub.f32 %v1665_v12, %v1689_v27 }
 0x34a   :  { %1636 = vrot.lane.b32.xlu0 %v1634_v44, %s3011_s3 }
 0x34e   :  { %v1738_v44 = vpop.permute.xlu1 %1737 }
 0x34f   :  { %1919 = vperm.xlu2 %2912, %v1914_v29   ;;  %v1679_v8 = vpop.permute.xlu2 %1678 }
 0x350   :  { %v1691_v36 = vmul.f32 %v1679_v8, %v3592_v24  ;;  %v1692_v61 = vmul.f32 %v1679_v8, %v3599_v31  ;;  %v1698_v8 = vsub.f32 %v1666_v25, %v1690_v4 }
 0x352   :  { %1686 = vperm.xlu0 %2894, %v3429_v26   ;;  %v1871_v26 = vperm.slane %v3178_v14, 0  ;;  %v1700_v59 = vsub.f32 %v1668_v55, %v1692_v61  ;;  %v3633_v61 = vadd.f32 %v1697_v7, %v3482_v57 }
 0x354   :  { %v3623_v43 = vadd.f32 %v1700_v59, %v3491_v33 }
 0x357   :  { %2914 = vset.pattern.permute.xlu2 %v3273_v5 }
 0x35a   :  { %2901 = vset.pattern.permute.xlu0 %v3268_v37 }
 0x35f   :  { %1938 = vperm.xlu2 %2914, %v1927_v3   ;;  %v1719_v23 = vpop.permute.xlu2 %1718 }
 0x362   :  { %1371 = vperm.xlu0 %2901, %v4139_v6  }
 0x367   :  { %v1732_v17 = vpop.permute.xlu2 %1731 }
 0x36a   :  { %1744 = vperm.xlu0 %2901, %v1739_v45   ;;  %v3576_v45 = vld [vmem:[%s4118_s0 + $0x10] sm:$0xff] }
 0x36b   :  { %v4128_v14 = vperm.slane %v3576_v45, 0  ;;  %v2123_v19 = vperm.slane %v3576_v45, 2 }
 0x36f   :  { %v1758_v55 = vpop.permute.xlu1 %1757 }
 0x372   :  { %2904 = vset.pattern.permute.xlu0 %v4137_v51 }
 0x373   :  { %1658 = vperm.xlu0 %2904, %v3394_v48   ;;  %v1953_v48 = vperm.slane %v3556_v54, 7 }
 0x377   :  { %v3615_v6 = vpop.permute.xlu2 %1750 }
 0x37b   :  { %1838 = vperm.xlu0 %2904, %v1833_v2   ;;  %v1671_v2 = vmul.f32 %v1663_v63, %v3594_v39 }
 0x383   :  { %2910 = vset.pattern.permute.xlu0 %v4138_v18 }
 0x384   :  { %1879 = vperm.xlu0 %2910, %v1871_v26   ;;  %v1699_v26 = vsub.f32 %v1667_v40, %v1691_v36  ;;  %v3630_v36 = vadd.f32 %v1698_v8, %v3485_v46  ;;  %v1765_v40 = vmul.f32 %v1719_v23, %v3633_v61  ;;  %v1768_v46 = vmul.f32 %v1738_v44, %v3623_v43 }
 0x386   :  { %v1766_v57 = vmul.f32 %v1725_v11, %v3630_v36  ;;  %v1773_v23 = vsel %vm30_vm0, %v1765_v40, 0.0 }
 0x388   :  { %v1774_v44 = vsel %vm30_vm0, %v1766_v57, 0.0 }
 0x38c   :  { %2916 = vset.pattern.permute.xlu0 %v3273_v5 }
 0x394   :  { %1964 = vperm.xlu0 %2916, %v1953_v48  }
 0x39c   :  { %2917 = vset.pattern.permute.xlu0 %v3268_v37 }
 0x3a4   :  { %1932 = vperm.xlu0 %2917, %v1927_v3   ;;  %v1672_v3 = vmul.f32 %v1663_v63, %v3601_v32 }
 0x3ac   :  { %2102 = vperm.xlu0 %2917, %v4128_v14   ;;  %v3626_v14 = vadd.f32 %v1699_v26, %v3488_v53  ;;  %v2311_v53 = vperm.slane %v3576_v45, 5  ;;  %v1775_v26 = vadd.f32 %v1774_v44, %v1773_v23 }
 0x3b4   :  { %2924 = vset.pattern.permute.xlu0 %v3273_v5 }
 0x3bc   :  { %2134 = vperm.xlu0 %2924, %v2123_v19   ;;  %v3588_v0 = vpop.permute.xlu0 %1636 }
 0x3c4   :  { %2925 = vset.pattern.permute.xlu0 %v4137_v51  ;;  %v1687_v62 = vpop.permute.xlu0 %1686 }
 0x3c5   :  { %2046 = vperm.xlu0 %2925, %v3590_v38   ;;  %v1695_v21 = vmul.f32 %v1687_v62, %v3592_v24  ;;  %v1696_v35 = vmul.f32 %v1687_v62, %v3599_v31 }
 0x3c7   :  { %v1704_v62 = vsub.f32 %v1672_v3, %v1696_v35  ;;  %v1764_v35 = vpop.permute.xlu2 %1763 }
 0x3c9   :  { %v3637_v25 = vadd.f32 %v1704_v62, %v3525_v1 }
 0x3cb   :  { %v1772_v1 = vmul.f32 %v1764_v35, %v3637_v25 }
 0x3cd   :  { %2226 = vperm.xlu0 %2925, %v2218_v56   ;;  %v1703_v56 = vsub.f32 %v1671_v2, %v1695_v21  ;;  %v1783_v2 = vsel %vm30_vm0, %v1768_v46, 0.0  ;;  %v1801_v59 = vsel %vm30_vm0, %v1772_v1, 0.0 }
 0x3cf   :  { %v3640_v33 = vadd.f32 %v1703_v56, %v3531_v28 }
 0x3d1   :  { %v1771_v28 = vmul.f32 %v1758_v55, %v3640_v33 }
 0x3d3   :  { %v1800_v7 = vsel %vm30_vm0, %v1771_v28, 0.0 }
 0x3d4   :  { %v1372_v50 = vpop.permute.xlu0 %1371  ;;  %v1802_v56 = vadd.f32 %v1801_v59, %v1800_v7 }
 0x3d5   :  { %v1385_v41 = vmul.f32 %v1372_v50, %v3528_v30  ;;  %2934 = vset.pattern.permute.xlu0 %v3273_v5  ;;  %v1767_v30 = vmul.f32 %v1732_v17, %v3626_v14 }
 0x3d6   :  { %v1803_v46 = vrot.slane %v1802_v56, 4 }
 0x3d7   :  { %v1414_v63 = vsel %vm30_vm0, %v1385_v41, 0.0  ;;  %v1782_v17 = vsel %vm30_vm0, %v1767_v30, 0.0  ;;  %v2256_v41 = vperm.slane %v3228_v58, 0 }
 0x3d8   :  { %v1416_v12 = vadd.f32 %v1415_v22, %v1414_v63  ;;  %v1784_v11 = vadd.f32 %v1783_v2, %v1782_v17  ;;  %v1693_v22 = vmul.f32 %v3586_v47, %v3592_v24  ;;  %v1694_v63 = vmul.f32 %v3586_v47, %v3599_v31 }
 0x3da   :  { %v1417_v21 = vrot.slane %v1416_v12, 4  ;;  %v1785_v50 = vrot.slane %v1784_v11, 4 }
 0x3dc   :  { %v1418_v52 = vadd.f32 %v1417_v21, %v1416_v12  ;;  %v1745_v27 = vpop.permute.xlu0 %1744  ;;  %v1776_v12 = vrot.slane %v1775_v26, 4  ;;  %v1786_v24 = vadd.f32 %v1785_v50, %v1784_v11 }
 0x3dd   :  { %2322 = vperm.xlu0 %2934, %v2311_v53  }
 0x3de   :  { %v1419_v4 = vrot.slane %v1418_v52, 2  ;;  %v1777_v31 = vadd.f32 %v1776_v12, %v1775_v26 }
 0x3e0   :  { %v1420_v3 = vadd.f32 %v1419_v4, %v1418_v52  ;;  %v1778_v17 = vrot.slane %v1777_v31, 2 }
 0x3e2   :  { %v1421_v8 = vrot.slane %v1420_v3, 1 }
 0x3e4   :  { %v1422_v62 = vadd.f32 %v1421_v8, %v1420_v3 }
 0x3e5   :  { %2935 = vset.pattern.permute.xlu0 %v4138_v18  ;;  %v1659_v30 = vpop.permute.xlu0 %1658 }
 0x3e6   :  { %v1669_v40 = vmul.f32 %v1659_v30, %v3594_v39  ;;  %v1670_v55 = vmul.f32 %v1659_v30, %v3601_v32  ;;  %2267 = vperm.xlu0 %2935, %v2256_v41   ;;  %v1432_v21 = vsel %vm1431_vm9, %v1422_v62, %v3470_v34  ;;  %v1787_v32 = vrot.slane %v1786_v24, 2 }
 0x3e7   :  { %v1434_v58 = vadd.f32 %v1432_v21, %v3542_v13  ;;  %v1804_v34 = vadd.f32 %v1803_v46, %v1802_v56  ;;  %v1940_v30 = vperm.slane %v3556_v54, 6  ;;  %v1873_v21 = vperm.slane %v3174_v10, 0  ;;  %v1843_v46 = vpop.permute.xlu2 %1842 }
 0x3e8   :  { %v1701_v57 = vsub.f32 %v1669_v40, %v1693_v22  ;;  %v1702_v47 = vsub.f32 %v1670_v55, %v1694_v63  ;;  %v3681_v22 = vpop.f32.mrf.mxu1  ;;  %v1835_v40 = vperm.slane %v3165_v60, 0  ;;  %v1870_v55 = vperm.slane %v3172_v9, 0 }
 0x3e9   :  { %1436 = vst.msk [vmem:[#allocation2] sm:$0xf] %vm1435_vm10, %v1434_v58  ;;  %v1805_v4 = vrot.slane %v1804_v34, 2  ;;  %1951 = vperm.xlu2 %2914, %v1940_v30   ;;  %v2029_v60 = vperm.slane %v3180_v15, 0  ;;  %v2027_v9 = vrot.slane %v3180_v15, 2  ;;  %v2110_v54 = vperm.slane %v3576_v45, 1 }
 0x3ea   :  { %v3668_v35 = vadd.f32 %v1701_v57, %v3512_v42  ;;  %v3671_v39 = vadd.f32 %v1702_v47, %v3500_v49  ;;  %1640 = vst.msk [vmem:[#allocation2 - $0x4] sm:$0xf0] %vm1639_vm11, %v3588_v0  ;;  %v1788_v42 = vadd.f32 %v1787_v32, %v1786_v24  ;;  %v1779_v49 = vadd.f32 %v1778_v17, %v1777_v31  ;;  %v643_v17 = vpop.f32.mrf.mxu0 }
 0x3eb   :  { %v1806_v0 = vadd.f32 %v1805_v4, %v1804_v34  ;;  %v3702_v10 = vperm.slane %v2027_v9, 0  ;;  %v2136_v32 = vperm.slane %v3576_v45, 3 }
 0x3ec   :  { %v1769_v52 = vmul.f32 %v1745_v27, %v3668_v35  ;;  %v1770_v13 = vmul.f32 %v3615_v6, %v3671_v39  ;;  %v1789_v11 = vrot.slane %v1788_v42, 1  ;;  %v1780_v26 = vrot.slane %v1779_v49, 1 }
 0x3ed   :  { %v1807_v7 = vrot.slane %v1806_v0, 1 }
 0x3ee   :  { %v1791_v1 = vsel %vm30_vm0, %v1769_v52, 0.0  ;;  %v1792_v28 = vsel %vm30_vm0, %v1770_v13, 0.0  ;;  %v1790_v27 = vadd.f32 %v1789_v11, %v1788_v42  ;;  %v1781_v6 = vadd.f32 %v1780_v26, %v1779_v49 }
 0x3ef   :  { %v1793_v23 = vadd.f32 %v1792_v28, %v1791_v1  ;;  %v1808_v56 = vadd.f32 %v1807_v7, %v1806_v0  ;;  %v3721_v31 = vpop.permute.xlu2 %1850 }
 0x3f0   :  { %v1813_v62 = vsel %vm1427_vm4, %v1790_v27, %v1781_v6  ;;  %v3715_v24 = vpop.f32.mrf.mxu1 }
 0x3f1   :  { %v1794_v2 = vrot.slane %v1793_v23, 4  ;;  %2919 = vset.pattern.permute.xlu2 %v4137_v51 }
 0x3f3   :  { %v1795_v44 = vadd.f32 %v1794_v2, %v1793_v23 }
 0x3f5   :  { %v1796_v3 = vrot.slane %v1795_v44, 2 }
 0x3f7   :  { %v1797_v59 = vadd.f32 %v1796_v3, %v1795_v44  ;;  %v1884_v1 = vpop.permute.xlu2 %1883  ;;  %v646_v44 = vpop.f32.mrf.mxu0 }
 0x3f8   :  { %v3719_v57 = vpop.f32.mrf.mxu1  ;;  %v1856_v27 = vmul.f32 %v1843_v46, %v646_v44 }
 0x3f9   :  { %v1798_v8 = vrot.slane %v1797_v59, 1 }
 0x3fb   :  { %v1799_v50 = vadd.f32 %v1798_v8, %v1797_v59  ;;  %v1855_v59 = vmul.f32 %v1843_v46, %v643_v17  ;;  %v4140_v46 = vld [vmem:[#allocation8_spill] sm:$0xff] }
 0x3fd   :  { %v1814_v41 = vsel %vm1429_vm5, %v1799_v50, %v1813_v62 }
 0x3fe   :  { %v1815_v63 = vsel %vm1431_vm9, %v1808_v56, %v1814_v41 }
 0x3ff   :  { %v1817_v12 = vadd.f32 %v1815_v63, %v3681_v22  ;;  %v1920_v42 = vpop.permute.xlu2 %1919 }
 0x400   :  { %v711_v34 = vpop.f32.mrf.mxu1 }
 0x401   :  { %1819 = vrot.lane.b32.xlu1 %v1817_v12, %s3012_s12 }
 0x408   :  { %v714_v28 = vpop.f32.mrf.mxu1 }
 0x409   :  { %1846 = vperm.xlu1 %2908, %v1835_v40  }
 0x411   :  { %2909 = vset.pattern.permute.xlu1 %v4138_v18 }
 0x412   :  { %1875 = vperm.xlu1 %2909, %v1870_v55   ;;  %v1895_v55 = vmul.f32 %v1884_v1, %v714_v28 }
 0x41a   :  { %1887 = vperm.xlu1 %2909, %v1873_v21  }
 0x422   :  { %2913 = vset.pattern.permute.xlu1 %v3273_v5 }
 0x42a   :  { %1925 = vperm.xlu1 %2913, %v1914_v29   ;;  %v2026_v29 = vrot.slane %v3180_v15, 1 }
 0x42c   :  { %v3706_v58 = vperm.slane %v2026_v29, 0 }
 0x432   :  { %2915 = vset.pattern.permute.xlu1 %v3268_v37 }
 0x43a   :  { %1945 = vperm.xlu1 %2915, %v1940_v30   ;;  %v1939_v30 = vpop.permute.xlu2 %1938 }
 0x442   :  { %1958 = vperm.xlu1 %2915, %v1953_v48  }
 0x44a   :  { %2918 = vset.pattern.permute.xlu1 %v4137_v51 }
 0x44b   :  { %2034 = vperm.xlu1 %2918, %v2029_v60  }
 0x453   :  { %2042 = vperm.xlu1 %2918, %v3702_v10  }
 0x45b   :  { %2921 = vset.pattern.permute.xlu1 %v4138_v18 }
 0x45c   :  { %2062 = vperm.xlu1 %2921, %v3706_v58  }
 0x464   :  { %2070 = vperm.xlu1 %2921, %v3590_v38   ;;  %v1839_v38 = vpop.permute.xlu0 %1838 }
 0x465   :  { %v1853_v0 = vmul.f32 %v1839_v38, %v643_v17  ;;  %v1854_v3 = vmul.f32 %v1839_v38, %v646_v44  ;;  %v2255_v38 = vperm.slane %v4140_v46, 0 }
 0x46c   :  { %2923 = vset.pattern.permute.xlu1 %v3268_v37  ;;  %v1880_v13 = vpop.permute.xlu0 %1879 }
 0x46d   :  { %v1892_v11 = vmul.f32 %v1880_v13, %v711_v34  ;;  %v1893_v26 = vmul.f32 %v1880_v13, %v714_v28 }
 0x46f   :  { %v1900_v6 = vsub.f32 %v1855_v59, %v1892_v11  ;;  %v1901_v50 = vsub.f32 %v1856_v27, %v1893_v26 }
 0x471   :  { %v3739_v40 = vadd.f32 %v1900_v6, %v3626_v14  ;;  %v3742_v21 = vadd.f32 %v1901_v50, %v3623_v43 }
 0x473   :  { %v1820_v48 = vpop.permute.xlu1 %1819 }
 0x474   :  { %1823 = vst.msk [vmem:[#allocation2] sm:$0xf] %vm1822_vm12, %v1820_v48  ;;  %2115 = vperm.xlu1 %2923, %v2110_v54   ;;  %v3729_v23 = vpop.permute.xlu0 %1964 }
 0x47b   :  { %v1847_v47 = vpop.permute.xlu1 %1846 }
 0x47c   :  { %2128 = vperm.xlu1 %2923, %v2123_v19   ;;  %v2217_v19 = vperm.slane %v3184_v16, 0  ;;  %v2220_v16 = vperm.slane %v3188_v20, 0  ;;  %v1933_v62 = vpop.permute.xlu0 %1932  ;;  %v1858_v41 = vmul.f32 %v1847_v47, %v646_v44  ;;  %v1857_v29 = vmul.f32 %v1847_v47, %v643_v17 }
 0x47d   :  { %v1968_v9 = vmul.f32 %v1933_v62, %v3739_v40 }
 0x47e   :  { %v1903_v48 = vsub.f32 %v1858_v41, %v1895_v55  ;;  %v2298_v41 = vperm.slane %v3576_v45, 4 }
 0x47f   :  { %v1983_v43 = vsel %vm30_vm0, %v1968_v9, 0.0 }
 0x484   :  { %2927 = vset.pattern.permute.xlu1 %v3273_v5  ;;  %v1876_v52 = vpop.permute.xlu1 %1875 }
 0x485   :  { %v1890_v2 = vmul.f32 %v1876_v52, %v711_v34  ;;  %v1891_v49 = vmul.f32 %v1876_v52, %v714_v28  ;;  %v1969_v52 = vmul.f32 %v1939_v30, %v3742_v21 }
 0x487   :  { %v1898_v7 = vsub.f32 %v1853_v0, %v1890_v2  ;;  %v1899_v8 = vsub.f32 %v1854_v3, %v1891_v49  ;;  %v1984_v11 = vsel %vm30_vm0, %v1969_v52, 0.0 }
 0x488   :  { %v1985_v0 = vadd.f32 %v1984_v11, %v1983_v43 }
 0x489   :  { %v3733_v63 = vadd.f32 %v1898_v7, %v3633_v61  ;;  %v3736_v12 = vadd.f32 %v1899_v8, %v3630_v36  ;;  %v1894_v36 = vmul.f32 %v1884_v1, %v711_v34  ;;  %v1860_v1 = vmul.f32 %v3721_v31, %v646_v44 }
 0x48b   :  { %v1966_v61 = vmul.f32 %v1920_v42, %v3733_v63  ;;  %v1902_v13 = vsub.f32 %v1857_v29, %v1894_v36  ;;  %v1952_v42 = vpop.permute.xlu2 %1951 }
 0x48c   :  { %2147 = vperm.xlu1 %2927, %v2136_v32   ;;  %v1888_v4 = vpop.permute.xlu1 %1887 }
 0x48d   :  { %v1897_v47 = vmul.f32 %v1888_v4, %v714_v28  ;;  %v1974_v2 = vsel %vm30_vm0, %v1966_v61, 0.0  ;;  %v1896_v26 = vmul.f32 %v1888_v4, %v711_v34  ;;  %v3760_v27 = vadd.f32 %v1902_v13, %v3668_v35 }
 0x48e   :  { %v1859_v28 = vmul.f32 %v3721_v31, %v643_v17 }
 0x48f   :  { %v1905_v59 = vsub.f32 %v1860_v1, %v1897_v47 }
 0x490   :  { %v1904_v6 = vsub.f32 %v1859_v28, %v1896_v26  ;;  %v3796_v28 = vld [vmem:[#allocation1] sm:$0xff] }
 0x491   :  { %v3767_v50 = vadd.f32 %v1905_v59, %v3637_v25  ;;  %v2411_v15 = vrot.slane %v3796_v28, 2 }
 0x492   :  { %v3772_v31 = vadd.f32 %v1904_v6, %v3640_v33 }
 0x493   :  { %v1973_v17 = vmul.f32 %v3729_v23, %v3767_v50 }
 0x494   :  { %2928 = vset.pattern.permute.xlu1 %v4137_v51 }
 0x495   :  { %2222 = vperm.xlu1 %2928, %v2217_v19   ;;  %v3753_v19 = vadd.f32 %v1903_v48, %v3671_v39  ;;  %v2002_v48 = vsel %vm30_vm0, %v1973_v17, 0.0 }
 0x497   :  { %v1971_v3 = vmul.f32 %v1952_v42, %v3753_v19 }
 0x499   :  { %v1993_v44 = vsel %vm30_vm0, %v1971_v3, 0.0 }
 0x49c   :  { %v1926_v56 = vpop.permute.xlu1 %1925 }
 0x49d   :  { %2234 = vperm.xlu1 %2928, %v2220_v16   ;;  %v1967_v20 = vmul.f32 %v1926_v56, %v3736_v12  ;;  %v1986_v16 = vrot.slane %v1985_v0, 4 }
 0x49f   :  { %v1975_v14 = vsel %vm30_vm0, %v1967_v20, 0.0  ;;  %v1987_v56 = vadd.f32 %v1986_v16, %v1985_v0  ;;  %v4141_v16 = vperm.slane %v3576_v45, 0 }
 0x4a0   :  { %v1976_v49 = vadd.f32 %v1975_v14, %v1974_v2 }
 0x4a1   :  { %v1988_v9 = vrot.slane %v1987_v56, 2 }
 0x4a2   :  { %v1977_v7 = vrot.slane %v1976_v49, 4 }
 0x4a3   :  { %v1989_v36 = vadd.f32 %v1988_v9, %v1987_v56 }
 0x4a4   :  { %v1978_v4 = vadd.f32 %v1977_v7, %v1976_v49 }
 0x4a5   :  { %2931 = vset.pattern.permute.xlu1 %v4138_v18  ;;  %v1990_v13 = vrot.slane %v1989_v36, 1 }
 0x4a6   :  { %2263 = vperm.xlu1 %2931, %v2255_v38   ;;  %v1979_v30 = vrot.slane %v1978_v4, 2 }
 0x4a7   :  { %v1991_v1 = vadd.f32 %v1990_v13, %v1989_v36 }
 0x4a8   :  { %v1980_v46 = vadd.f32 %v1979_v30, %v1978_v4  ;;  %v2635_v30 = vld [vmem:[#allocation1 + $0x6] ss:$9 sm:$0xff] }
 0x4aa   :  { %v1981_v23 = vrot.slane %v1980_v46, 1 }
 0x4ac   :  { %v1946_v39 = vpop.permute.xlu1 %1945  ;;  %v1982_v2 = vadd.f32 %v1981_v23, %v1980_v46  ;;  %v2103_v46 = vpop.permute.xlu0 %2102 }
 0x4ad   :  { %v1970_v8 = vmul.f32 %v1946_v39, %v3760_v27  ;;  %v2337_v39 = vperm.slane %v3576_v45, 7 }
 0x4ae   :  { %2932 = vset.pattern.permute.xlu1 %v3268_v37  ;;  %v2014_v3 = vsel %vm1627_vm6, %v1991_v1, %v1982_v2 }
 0x4af   :  { %v1992_v34 = vsel %vm30_vm0, %v1970_v8, 0.0 }
 0x4b0   :  { %v1994_v35 = vadd.f32 %v1993_v44, %v1992_v34  ;;  %v4142_v34 = vld [vmem:[#allocation12_spill] sm:$0xff] }
 0x4b1   :  { %v2601_v4 = vperm.slane %v4142_v34, 0 }
 0x4b2   :  { %v1995_v62 = vrot.slane %v1994_v35, 4 }
 0x4b4   :  { %v1996_v55 = vadd.f32 %v1995_v62, %v1994_v35  ;;  %v1959_v20 = vpop.permute.xlu1 %1958  ;;  %v2633_v62 = vld [vmem:[#allocation1 + $0x5] ss:$9 sm:$0xff]  ;;  %v2135_v34 = vpop.permute.xlu0 %2134 }
 0x4b5   :  { %v1972_v25 = vmul.f32 %v1959_v20, %v3772_v31  ;;  %v2640_v20 = vperm.slane %v2635_v30, 0 }
 0x4b6   :  { %v1997_v29 = vrot.slane %v1996_v55, 2  ;;  %2303 = vperm.xlu1 %2932, %v2298_v41  }
 0x4b7   :  { %v2001_v61 = vsel %vm30_vm0, %v1972_v25, 0.0 }
 0x4b8   :  { %v2003_v33 = vadd.f32 %v2002_v48, %v2001_v61  ;;  %v1998_v38 = vadd.f32 %v1997_v29, %v1996_v55  ;;  %v845_v29 = vpop.f32.mrf.mxu3  ;;  %v777_v48 = vpop.f32.mrf.mxu2 }
 0x4ba   :  { %v2004_v52 = vrot.slane %v2003_v33, 4  ;;  %v1999_v43 = vrot.slane %v1998_v38, 1 }
 0x4bc   :  { %v2005_v14 = vadd.f32 %v2004_v52, %v2003_v33  ;;  %v2000_v49 = vadd.f32 %v1999_v43, %v1998_v38 }
 0x4bd   :  { %v2035_v35 = vpop.permute.xlu1 %2034 }
 0x4be   :  { %v2006_v47 = vrot.slane %v2005_v14, 2  ;;  %2316 = vperm.xlu1 %2932, %v2311_v53   ;;  %v2015_v26 = vsel %vm1629_vm7, %v2000_v49, %v2014_v3  ;;  %v2324_v53 = vperm.slane %v3576_v45, 6 }
 0x4c0   :  { %v2007_v42 = vadd.f32 %v2006_v47, %v2005_v14  ;;  %v848_v38 = vpop.f32.mrf.mxu3  ;;  %v780_v14 = vpop.f32.mrf.mxu2  ;;  %v2049_v47 = vmul.f32 %v2035_v35, %v777_v48 }
 0x4c1   :  { %v2050_v2 = vmul.f32 %v2035_v35, %v780_v14 }
 0x4c2   :  { %v2008_v11 = vrot.slane %v2007_v42, 1 }
 0x4c4   :  { %v2009_v0 = vadd.f32 %v2008_v11, %v2007_v42 }
 0x4c5   :  { %v2043_v17 = vpop.permute.xlu1 %2042 }
 0x4c6   :  { %2937 = vset.pattern.permute.xlu1 %v3273_v5  ;;  %v2016_v59 = vsel %vm1631_vm8, %v2009_v0, %v2015_v26  ;;  %v2053_v1 = vmul.f32 %v2043_v17, %v777_v48  ;;  %v2054_v11 = vmul.f32 %v2043_v17, %v780_v14 }
 0x4c7   :  { %v2018_v7 = vadd.f32 %v2016_v59, %v3681_v22  ;;  %v2410_v22 = vrot.slane %v3796_v28, 1 }
 0x4c9   :  { %2020 = vrot.lane.b32.xlu2 %v2018_v7, %s3013_s13  ;;  %v3801_v8 = vperm.slane %v2410_v22, 0 }
 0x4ce   :  { %2335 = vperm.xlu1 %2937, %v2324_v53   ;;  %v2063_v25 = vpop.permute.xlu1 %2062 }
 0x4cf   :  { %v2075_v42 = vmul.f32 %v2063_v25, %v845_v29 }
 0x4d1   :  { %2038 = vperm.xlu2 %2919, %v3706_v58   ;;  %v2413_v58 = vperm.slane %v3796_v28, 0 }
 0x4d6   :  { %2348 = vperm.xlu1 %2937, %v2337_v39   ;;  %v2071_v61 = vpop.permute.xlu1 %2070 }
 0x4d9   :  { %2920 = vset.pattern.permute.xlu2 %v4138_v18 }
 0x4da   :  { %2058 = vperm.xlu2 %2920, %v2029_v60   ;;  %v3812_v60 = vperm.slane %v2411_v15, 0 }
 0x4de   :  { %2939 = vset.pattern.permute.xlu1 %v4137_v51 }
 0x4df   :  { %2422 = vperm.xlu1 %2939, %v3801_v8  }
 0x4e2   :  { %2066 = vperm.xlu2 %2920, %v3702_v10   ;;  %v3823_v10 = vld [vmem:[%s4118_s0 + $0x18] sm:$0xff]  ;;  %s3014_s0 = smov 64  }
 0x4e3   :  { %v2481_v44 = vperm.slane %v3823_v10, 0  ;;  %v2494_v6 = vperm.slane %v3823_v10, 1  ;;  %v2682_v45 = vperm.slane %v3823_v10, 4 }
 0x4e6   :  { %v2116_v49 = vpop.permute.xlu1 %2115 }
 0x4e7   :  { %2940 = vset.pattern.permute.xlu1 %v4138_v18 }
 0x4e8   :  { %2442 = vperm.xlu1 %2940, %v2413_v58  }
 0x4ea   :  { %2922 = vset.pattern.permute.xlu2 %v3273_v5 }
 0x4f0   :  { %2450 = vperm.xlu1 %2940, %v3812_v60  }
 0x4f2   :  { %2108 = vperm.xlu2 %2922, %v4141_v16   ;;  %v2076_v16 = vmul.f32 %v2063_v25, %v848_v38 }
 0x4f8   :  { %2944 = vset.pattern.permute.xlu1 %v3273_v5 }
 0x4fa   :  { %2121 = vperm.xlu2 %2922, %v2110_v54   ;;  %v2520_v54 = vperm.slane %v3823_v10, 3 }
 0x500   :  { %2492 = vperm.xlu1 %2944, %v2481_v44  }
 0x502   :  { %2926 = vset.pattern.permute.xlu2 %v3268_v37 }
 0x508   :  { %2505 = vperm.xlu1 %2944, %v2494_v6  }
 0x50a   :  { %2141 = vperm.xlu2 %2926, %v2136_v32   ;;  %v2639_v32 = vperm.slane %v2633_v62, 0 }
 0x510   :  { %2946 = vset.pattern.permute.xlu1 %v3268_v37 }
 0x512   :  { %2929 = vset.pattern.permute.xlu2 %v4137_v51 }
 0x518   :  { %2525 = vperm.xlu1 %2946, %v2520_v54  }
 0x520   :  { %2947 = vset.pattern.permute.xlu1 %v4137_v51 }
 0x521   :  { %2606 = vperm.xlu1 %2947, %v2601_v4  }
 0x523   :  { %v2021_v56 = vpop.permute.xlu2 %2020 }
 0x524   :  { %2024 = vst.msk [vmem:[#allocation2 - $0x4] sm:$0xf0] %vm2023_vm13, %v2021_v56 }
 0x529   :  { %2949 = vset.pattern.permute.xlu1 %v4138_v18 }
 0x52a   :  { %2647 = vperm.xlu1 %2949, %v2639_v32  }
 0x52b   :  { %v2039_v55 = vpop.permute.xlu2 %2038 }
 0x52c   :  { %v2051_v36 = vmul.f32 %v2039_v55, %v777_v48  ;;  %v2052_v0 = vmul.f32 %v2039_v55, %v780_v14  ;;  %v2129_v55 = vpop.permute.xlu1 %2128 }
 0x52e   :  { %v2083_v3 = vsub.f32 %v2051_v36, %v2075_v42  ;;  %v2084_v4 = vsub.f32 %v2052_v0, %v2076_v16 }
 0x530   :  { %v3844_v56 = vadd.f32 %v2083_v3, %v3739_v40  ;;  %v3861_v40 = vadd.f32 %v2084_v4, %v3742_v21 }
 0x532   :  { %2651 = vperm.xlu1 %2949, %v2640_v20  }
 0x534   :  { %v2059_v9 = vpop.permute.xlu2 %2058 }
 0x535   :  { %v2073_v52 = vmul.f32 %v2059_v9, %v845_v29  ;;  %v2074_v23 = vmul.f32 %v2059_v9, %v848_v38 }
 0x537   :  { %v2081_v26 = vsub.f32 %v2049_v47, %v2073_v52  ;;  %v2082_v59 = vsub.f32 %v2050_v2, %v2074_v23  ;;  %v2047_v52 = vpop.permute.xlu0 %2046  ;;  %v2080_v47 = vmul.f32 %v2071_v61, %v848_v38 }
 0x538   :  { %v2056_v42 = vmul.f32 %v2047_v52, %v780_v14  ;;  %v2055_v0 = vmul.f32 %v2047_v52, %v777_v48 }
 0x539   :  { %v3847_v62 = vadd.f32 %v2081_v26, %v3733_v63  ;;  %v3850_v35 = vadd.f32 %v2082_v59, %v3736_v12  ;;  %v2151_v63 = vmul.f32 %v2116_v49, %v3844_v56  ;;  %v2079_v49 = vmul.f32 %v2071_v61, %v845_v29 }
 0x53a   :  { %2952 = vset.pattern.permute.xlu1 %v3268_v37  ;;  %v2088_v3 = vsub.f32 %v2056_v42, %v2080_v47 }
 0x53b   :  { %v2149_v20 = vmul.f32 %v2103_v46, %v3847_v62  ;;  %v2166_v36 = vsel %vm30_vm0, %v2151_v63, 0.0  ;;  %v2087_v59 = vsub.f32 %v2055_v0, %v2079_v49  ;;  %v4144_v0 = vld [vmem:[#allocation6_spill] sm:$0xff] }
 0x53c   :  { %v2067_v33 = vpop.permute.xlu2 %2066  ;;  %v3874_v16 = vadd.f32 %v2088_v3, %v3767_v50  ;;  %v2254_v3 = vperm.slane %v4144_v0, 0 }
 0x53d   :  { %v2077_v43 = vmul.f32 %v2067_v33, %v845_v29  ;;  %v2078_v13 = vmul.f32 %v2067_v33, %v848_v38  ;;  %v2157_v33 = vsel %vm30_vm0, %v2149_v20, 0.0  ;;  %v3878_v38 = vadd.f32 %v2087_v59, %v3772_v31 }
 0x53f   :  { %v2085_v7 = vsub.f32 %v2053_v1, %v2077_v43  ;;  %v2086_v22 = vsub.f32 %v2054_v11, %v2078_v13 }
 0x541   :  { %v3853_v32 = vadd.f32 %v2085_v7, %v3760_v27  ;;  %v3856_v17 = vadd.f32 %v2086_v22, %v3753_v19  ;;  %v2148_v22 = vpop.permute.xlu1 %2147 }
 0x542   :  { %v2156_v4 = vmul.f32 %v2148_v22, %v3874_v16  ;;  %2687 = vperm.xlu1 %2952, %v2682_v45  }
 0x543   :  { %v2153_v25 = vmul.f32 %v2129_v55, %v3853_v32  ;;  %v2154_v12 = vmul.f32 %v2135_v34, %v3856_v17 }
 0x544   :  { %v2185_v55 = vsel %vm30_vm0, %v2156_v4, 0.0  ;;  %v2227_v4 = vpop.permute.xlu0 %2226 }
 0x545   :  { %v2175_v21 = vsel %vm30_vm0, %v2153_v25, 0.0  ;;  %v2176_v23 = vsel %vm30_vm0, %v2154_v12, 0.0 }
 0x546   :  { %v2177_v1 = vadd.f32 %v2176_v23, %v2175_v21 }
 0x548   :  { %v2178_v7 = vrot.slane %v2177_v1, 4 }
 0x54a   :  { %2956 = vset.pattern.permute.xlu1 %v3273_v5 }
 0x54c   :  { %v2109_v15 = vpop.permute.xlu2 %2108 }
 0x54d   :  { %v2150_v30 = vmul.f32 %v2109_v15, %v3850_v35 }
 0x54f   :  { %v2158_v27 = vsel %vm30_vm0, %v2150_v30, 0.0  ;;  %v2179_v30 = vadd.f32 %v2178_v7, %v2177_v1  ;;  %v4143_v1 = vld [vmem:[#allocation5_spill] sm:$0xff]  ;;  %v2412_v7 = vrot.slane %v3796_v28, 3 }
 0x550   :  { %v2159_v43 = vadd.f32 %v2158_v27, %v2157_v33 }
 0x551   :  { %v2180_v20 = vrot.slane %v2179_v30, 2  ;;  %v3903_v22 = vperm.slane %v2412_v7, 0 }
 0x552   :  { %v2160_v11 = vrot.slane %v2159_v43, 4 }
 0x553   :  { %v2181_v27 = vadd.f32 %v2180_v20, %v2179_v30  ;;  %v912_v30 = vpop.f32.mrf.mxu0 }
 0x554   :  { %v2122_v9 = vpop.permute.xlu2 %2121  ;;  %v2161_v15 = vadd.f32 %v2160_v11, %v2159_v43  ;;  %v2219_v11 = vperm.slane %v4143_v1, 0 }
 0x555   :  { %v2152_v19 = vmul.f32 %v2122_v9, %v3861_v40 }
 0x556   :  { %v2162_v29 = vrot.slane %v2161_v15, 2 }
 0x557   :  { %v2167_v46 = vsel %vm30_vm0, %v2152_v19, 0.0 }
 0x558   :  { %v2168_v13 = vadd.f32 %v2167_v46, %v2166_v36  ;;  %v2163_v25 = vadd.f32 %v2162_v29, %v2161_v15  ;;  %v2182_v46 = vrot.slane %v2181_v27, 1  ;;  %v2323_v29 = vpop.permute.xlu0 %2322 }
 0x55a   :  { %v2169_v2 = vrot.slane %v2168_v13, 4  ;;  %v2164_v19 = vrot.slane %v2163_v25, 1 }
 0x55c   :  { %v2170_v26 = vadd.f32 %v2169_v2, %v2168_v13  ;;  %v2165_v52 = vadd.f32 %v2164_v19, %v2163_v25  ;;  %v2183_v13 = vadd.f32 %v2182_v46, %v2181_v27  ;;  %v2239_v27 = vmul.f32 %v2227_v4, %v912_v30 }
 0x55e   :  { %v2171_v34 = vrot.slane %v2170_v26, 2 }
 0x560   :  { %v2172_v14 = vadd.f32 %v2171_v34, %v2170_v26  ;;  %v4145_v26 = vld [vmem:[#allocation7_spill] sm:$0xff]  ;;  %v980_v34 = vpop.f32.mrf.mxu1 }
 0x561   :  { %v2257_v59 = vperm.slane %v4145_v26, 0 }
 0x562   :  { %v2173_v12 = vrot.slane %v2172_v14, 1 }
 0x564   :  { %v2142_v61 = vpop.permute.xlu2 %2141  ;;  %v2174_v36 = vadd.f32 %v2173_v12, %v2172_v14 }
 0x565   :  { %v2155_v48 = vmul.f32 %v2142_v61, %v3878_v38 }
 0x566   :  { %v2197_v43 = vsel %vm1427_vm4, %v2174_v36, %v2165_v52  ;;  %v2268_v52 = vpop.permute.xlu0 %2267 }
 0x567   :  { %v2184_v63 = vsel %vm30_vm0, %v2155_v48, 0.0  ;;  %v2198_v2 = vsel %vm1429_vm5, %v2183_v13, %v2197_v43 }
 0x568   :  { %v2186_v50 = vadd.f32 %v2185_v55, %v2184_v63  ;;  %v983_v48 = vpop.f32.mrf.mxu1  ;;  %v915_v63 = vpop.f32.mrf.mxu0 }
 0x569   :  { %v2240_v19 = vmul.f32 %v2227_v4, %v915_v63 }
 0x56a   :  { %v2187_v9 = vrot.slane %v2186_v50, 4 }
 0x56c   :  { %v2188_v33 = vadd.f32 %v2187_v9, %v2186_v50 }
 0x56e   :  { %v2189_v31 = vrot.slane %v2188_v33, 2 }
 0x570   :  { %v2190_v21 = vadd.f32 %v2189_v31, %v2188_v33 }
 0x572   :  { %v2191_v23 = vrot.slane %v2190_v21, 1 }
 0x574   :  { %v2192_v47 = vadd.f32 %v2191_v23, %v2190_v21 }
 0x576   :  { %v2199_v42 = vsel %vm1431_vm9, %v2192_v47, %v2198_v2 }
 0x577   :  { %v2201_v49 = vadd.f32 %v2199_v42, %v3715_v24  ;;  %v2279_v42 = vmul.f32 %v2268_v52, %v983_v48 }
 0x579   :  { %2203 = vrot.lane.b32.xlu2 %v2201_v49, %s3014_s0 }
 0x581   :  { %2230 = vperm.xlu2 %2929, %v2219_v11  }
 0x589   :  { %2930 = vset.pattern.permute.xlu2 %v4138_v18 }
 0x58a   :  { %2259 = vperm.xlu2 %2930, %v2254_v3   ;;  %v2278_v3 = vmul.f32 %v2268_v52, %v980_v34 }
 0x592   :  { %2271 = vperm.xlu2 %2930, %v2257_v59  }
 0x59a   :  { %2933 = vset.pattern.permute.xlu2 %v3273_v5 }
 0x5a2   :  { %2309 = vperm.xlu2 %2933, %v2298_v41   ;;  %v2223_v41 = vpop.permute.xlu1 %2222 }
 0x5a3   :  { %v2237_v12 = vmul.f32 %v2223_v41, %v912_v30  ;;  %v2238_v9 = vmul.f32 %v2223_v41, %v915_v63 }
 0x5aa   :  { %2936 = vset.pattern.permute.xlu2 %v3268_v37 }
 0x5b2   :  { %2329 = vperm.xlu2 %2936, %v2324_v53   ;;  %v3911_v53 = vpop.permute.xlu1 %2234 }
 0x5b3   :  { %v2244_v4 = vmul.f32 %v3911_v53, %v915_v63 }
 0x5ba   :  { %2342 = vperm.xlu2 %2936, %v2337_v39   ;;  %v2264_v39 = vpop.permute.xlu1 %2263 }
 0x5bb   :  { %v2276_v25 = vmul.f32 %v2264_v39, %v980_v34  ;;  %v2277_v50 = vmul.f32 %v2264_v39, %v983_v48 }
 0x5bd   :  { %v2284_v36 = vsub.f32 %v2239_v27, %v2276_v25  ;;  %v2285_v31 = vsub.f32 %v2240_v19, %v2277_v50 }
 0x5bf   :  { %v3924_v21 = vadd.f32 %v2284_v36, %v3844_v56  ;;  %v3927_v23 = vadd.f32 %v2285_v31, %v3861_v40 }
 0x5c1   :  { %v2353_v11 = vmul.f32 %v2323_v29, %v3927_v23 }
 0x5c2   :  { %2938 = vset.pattern.permute.xlu2 %v4137_v51 }
 0x5c3   :  { %2418 = vperm.xlu2 %2938, %v2413_v58   ;;  %v2304_v58 = vpop.permute.xlu1 %2303  ;;  %v2368_v59 = vsel %vm30_vm0, %v2353_v11, 0.0 }
 0x5cb   :  { %2430 = vperm.xlu2 %2938, %v3903_v22   ;;  %v2317_v61 = vpop.permute.xlu1 %2316 }
 0x5cc   :  { %v2352_v1 = vmul.f32 %v2317_v61, %v3924_v21 }
 0x5d3   :  { %2941 = vset.pattern.permute.xlu2 %v4138_v18  ;;  %v2204_v15 = vpop.permute.xlu2 %2203  ;;  %v2336_v46 = vpop.permute.xlu1 %2335 }
 0x5d4   :  { %2207 = vst.msk [vmem:[#allocation2] sm:$0xf] %vm2206_vm14, %v2204_v15  ;;  %2446 = vperm.xlu2 %2941, %v3801_v8  }
 0x5db   :  { %v2231_v28 = vpop.permute.xlu2 %2230  ;;  %v2349_v26 = vpop.permute.xlu1 %2348 }
 0x5dc   :  { %2943 = vset.pattern.permute.xlu2 %v3268_v37  ;;  %v2242_v13 = vmul.f32 %v2231_v28, %v915_v63  ;;  %v2241_v56 = vmul.f32 %v2231_v28, %v912_v30  ;;  %v2631_v28 = vld [vmem:[#allocation1 + $0x4] ss:$9 sm:$0xff] }
 0x5de   :  { %v2287_v0 = vsub.f32 %v2242_v13, %v2279_v42  ;;  %v2286_v7 = vsub.f32 %v2241_v56, %v2278_v3 }
 0x5e0   :  { %v3945_v41 = vadd.f32 %v2287_v0, %v3856_v17 }
 0x5e4   :  { %2486 = vperm.xlu2 %2943, %v2481_v44   ;;  %v2260_v8 = vpop.permute.xlu2 %2259  ;;  %v2507_v44 = vperm.slane %v3823_v10, 2 }
 0x5e5   :  { %v2274_v55 = vmul.f32 %v2260_v8, %v980_v34  ;;  %v2275_v20 = vmul.f32 %v2260_v8, %v983_v48  ;;  %v2638_v8 = vperm.slane %v2631_v28, 0 }
 0x5e7   :  { %v2282_v33 = vsub.f32 %v2237_v12, %v2274_v55  ;;  %v3950_v55 = vadd.f32 %v2286_v7, %v3853_v32 }
 0x5e9   :  { %v3930_v47 = vadd.f32 %v2282_v33, %v3847_v62 }
 0x5eb   :  { %v2350_v40 = vmul.f32 %v2304_v58, %v3930_v47 }
 0x5ec   :  { %2499 = vperm.xlu2 %2943, %v2494_v6   ;;  %v2272_v14 = vpop.permute.xlu2 %2271  ;;  %v2283_v6 = vsub.f32 %v2238_v9, %v2275_v20  ;;  %v2355_v20 = vmul.f32 %v2336_v46, %v3945_v41 }
 0x5ed   :  { %v2281_v15 = vmul.f32 %v2272_v14, %v983_v48  ;;  %v2358_v39 = vsel %vm30_vm0, %v2350_v40, 0.0  ;;  %v2280_v29 = vmul.f32 %v2272_v14, %v980_v34  ;;  %v2243_v48 = vmul.f32 %v3911_v53, %v912_v30  ;;  %v3961_v14 = vpop.permute.xlu1 %2422  ;;  %v3965_v30 = vpop.f32.mrf.mxu2 }
 0x5ee   :  { %v3933_v2 = vadd.f32 %v2283_v6, %v3850_v35  ;;  %v2367_v35 = vsel %vm30_vm0, %v2352_v1, 0.0  ;;  %v2377_v32 = vsel %vm30_vm0, %v2355_v20, 0.0  ;;  %v3963_v6 = vpop.f32.mrf.mxu3 }
 0x5ef   :  { %v2289_v61 = vsub.f32 %v2244_v4, %v2281_v15  ;;  %v2288_v63 = vsub.f32 %v2243_v48, %v2280_v29 }
 0x5f1   :  { %v3957_v9 = vadd.f32 %v2289_v61, %v3874_v16  ;;  %v3968_v36 = vadd.f32 %v2288_v63, %v3878_v38 }
 0x5f3   :  { %v2357_v16 = vmul.f32 %v2349_v26, %v3957_v9 }
 0x5f4   :  { %2945 = vset.pattern.permute.xlu2 %v3273_v5 }
 0x5f5   :  { %v2386_v56 = vsel %vm30_vm0, %v2357_v16, 0.0  ;;  %v3979_v28 = vpop.f32.mrf.mxu2 }
 0x5f6   :  { %v3977_v7 = vpop.f32.mrf.mxu3 }
 0x5fc   :  { %2518 = vperm.xlu2 %2945, %v2507_v44   ;;  %v2310_v43 = vpop.permute.xlu2 %2309 }
 0x5fd   :  { %v2351_v49 = vmul.f32 %v2310_v43, %v3933_v2  ;;  %v4146_v43 = vld [vmem:[#allocation10_spill] sm:$0xff] }
 0x5fe   :  { %v2603_v13 = vperm.slane %v4146_v43, 0  ;;  %v2708_v43 = vperm.slane %v3823_v10, 6 }
 0x5ff   :  { %v2359_v62 = vsel %vm30_vm0, %v2351_v49, 0.0 }
 0x600   :  { %v2360_v58 = vadd.f32 %v2359_v62, %v2358_v39  ;;  %v2695_v62 = vperm.slane %v3823_v10, 5 }
 0x602   :  { %v2361_v25 = vrot.slane %v2360_v58, 4  ;;  %2706 = vperm.xlu1 %2956, %v2695_v62  }
 0x604   :  { %2531 = vperm.xlu2 %2945, %v2520_v54   ;;  %v2369_v54 = vadd.f32 %v2368_v59, %v2367_v35  ;;  %v2362_v27 = vadd.f32 %v2361_v25, %v2360_v58  ;;  %v2443_v35 = vpop.permute.xlu1 %2442  ;;  %v2637_v59 = vld [vmem:[#allocation1 + $0x7] ss:$9 sm:$0xff] }
 0x605   :  { %v2457_v4 = vmul.f32 %v2443_v35, %v3963_v6  ;;  %v2641_v29 = vperm.slane %v2637_v59, 0  ;;  %v2458_v61 = vmul.f32 %v2443_v35, %v3977_v7 }
 0x606   :  { %v2370_v50 = vrot.slane %v2369_v54, 4  ;;  %v2363_v31 = vrot.slane %v2362_v27, 2 }
 0x608   :  { %v2371_v33 = vadd.f32 %v2370_v50, %v2369_v54  ;;  %v2364_v38 = vadd.f32 %v2363_v31, %v2362_v27 }
 0x60a   :  { %v2372_v42 = vrot.slane %v2371_v33, 2  ;;  %v2365_v15 = vrot.slane %v2364_v38, 1  ;;  %2719 = vperm.xlu1 %2956, %v2708_v43  }
 0x60c   :  { %2948 = vset.pattern.permute.xlu2 %v4138_v18  ;;  %v2330_v17 = vpop.permute.xlu2 %2329  ;;  %v2373_v40 = vadd.f32 %v2372_v42, %v2371_v33  ;;  %v2366_v48 = vadd.f32 %v2365_v15, %v2364_v38 }
 0x60d   :  { %v2354_v12 = vmul.f32 %v2330_v17, %v3950_v55  ;;  %2643 = vperm.xlu2 %2948, %v2638_v8  }
 0x60e   :  { %v2374_v58 = vrot.slane %v2373_v40, 1 }
 0x60f   :  { %v2376_v34 = vsel %vm30_vm0, %v2354_v12, 0.0 }
 0x610   :  { %v2378_v19 = vadd.f32 %v2377_v32, %v2376_v34 }
 0x612   :  { %v2379_v53 = vrot.slane %v2378_v19, 4 }
 0x614   :  { %v2380_v46 = vadd.f32 %v2379_v53, %v2378_v19  ;;  %v2343_v52 = vpop.permute.xlu2 %2342  ;;  %v2375_v19 = vadd.f32 %v2374_v58, %v2373_v40  ;;  %v4147_v40 = vld [vmem:[#allocation9_spill] sm:$0xff] }
 0x615   :  { %v2356_v49 = vmul.f32 %v2343_v52, %v3968_v36  ;;  %2950 = vset.pattern.permute.xlu2 %v4137_v51 }
 0x616   :  { %v2381_v1 = vrot.slane %v2380_v46, 2  ;;  %2614 = vperm.xlu2 %2950, %v2603_v13   ;;  %v2398_v16 = vsel %vm1627_vm6, %v2375_v19, %v2366_v48  ;;  %v2436_v13 = vmul.f32 %v3961_v14, %v3979_v28 }
 0x617   :  { %v2385_v11 = vsel %vm30_vm0, %v2356_v49, 0.0 }
 0x618   :  { %v2387_v0 = vadd.f32 %v2386_v56, %v2385_v11  ;;  %v2382_v3 = vadd.f32 %v2381_v1, %v2380_v46  ;;  %v4008_v11 = vpop.permute.xlu1 %2450 }
 0x61a   :  { %v2388_v26 = vrot.slane %v2387_v0, 4  ;;  %v2383_v54 = vrot.slane %v2382_v3, 1 }
 0x61c   :  { %v2389_v39 = vadd.f32 %v2388_v26, %v2387_v0  ;;  %v2384_v34 = vadd.f32 %v2383_v54, %v2382_v3  ;;  %v2602_v3 = vperm.slane %v4147_v40, 0  ;;  %v4148_v54 = vld [vmem:[#allocation11_spill] sm:$0xff] }
 0x61d   :  { %v2419_v8 = vpop.permute.xlu2 %2418 }
 0x61e   :  { %v2390_v20 = vrot.slane %v2389_v39, 2  ;;  %v2433_v25 = vmul.f32 %v2419_v8, %v3965_v30  ;;  %v2434_v17 = vmul.f32 %v2419_v8, %v3979_v28  ;;  %2951 = vset.pattern.permute.xlu2 %v4138_v18  ;;  %v2399_v18 = vsel %vm1629_vm7, %v2384_v34, %v2398_v16 }
 0x61f   :  { %2655 = vperm.xlu2 %2951, %v2641_v29   ;;  %v2604_v8 = vperm.slane %v4148_v54, 0 }
 0x620   :  { %v2391_v50 = vadd.f32 %v2390_v20, %v2389_v39  ;;  %v2465_v12 = vsub.f32 %v2433_v25, %v2457_v4  ;;  %v2466_v63 = vsub.f32 %v2434_v17, %v2458_v61  ;;  %v2493_v56 = vpop.permute.xlu1 %2492  ;;  %v2721_v25 = vperm.slane %v3823_v10, 7  ;;  %v4045_v10 = vpop.f32.mrf.mxu0 }
 0x622   :  { %v2392_v32 = vrot.slane %v2391_v50, 1  ;;  %v3987_v27 = vadd.f32 %v2466_v63, %v3933_v2  ;;  %v3990_v33 = vadd.f32 %v2465_v12, %v3930_v47  ;;  %v2435_v2 = vmul.f32 %v3961_v14, %v3965_v30 }
 0x624   :  { %v2393_v53 = vadd.f32 %v2392_v32, %v2391_v50  ;;  %v2534_v38 = vmul.f32 %v2493_v56, %v3987_v27 }
 0x625   :  { %v3993_v31 = vpop.permute.xlu2 %2430 }
 0x626   :  { %v2400_v46 = vsel %vm1631_vm8, %v2393_v53, %v2399_v18  ;;  %v2542_v35 = vsel %vm30_vm0, %v2534_v38, 0.0 }
 0x627   :  { %v2402_v52 = vadd.f32 %v2400_v46, %v3715_v24  ;;  %2955 = vset.pattern.permute.xlu2 %v3268_v37 }
 0x628   :  { %v2506_v26 = vpop.permute.xlu1 %2505 }
 0x629   :  { %2404 = vrot.lane.b32.xlu0 %v2402_v52, %s3006_s28 }
 0x62e   :  { %v2447_v47 = vpop.permute.xlu2 %2446 }
 0x62f   :  { %v2459_v42 = vmul.f32 %v2447_v47, %v3963_v6  ;;  %v2460_v49 = vmul.f32 %v2447_v47, %v3977_v7  ;;  %2700 = vperm.xlu2 %2955, %v2695_v62  }
 0x630   :  { %v4039_v18 = vpop.permute.xlu1 %2525 }
 0x631   :  { %v2467_v24 = vsub.f32 %v2435_v2, %v2459_v42  ;;  %v2468_v1 = vsub.f32 %v2436_v13, %v2460_v49  ;;  %2454 = vperm.xlu0 %2935, %v3903_v22   ;;  %v4043_v13 = vpop.f32.mrf.mxu1 }
 0x633   :  { %v4017_v62 = vadd.f32 %v2468_v1, %v3927_v23  ;;  %v2475_v59 = vadd.f32 %v2467_v24, %v3924_v21  ;;  %v4051_v1 = vpop.f32.mrf.mxu0 }
 0x635   :  { %v2536_v15 = vmul.f32 %v2506_v26, %v4017_v62 }
 0x637   :  { %2713 = vperm.xlu2 %2955, %v2708_v43   ;;  %v2551_v29 = vsel %vm30_vm0, %v2536_v15, 0.0 }
 0x638   :  { %v2607_v52 = vpop.permute.xlu1 %2606 }
 0x639   :  { %2942 = vset.pattern.permute.xlu0 %v4137_v51  ;;  %v4049_v24 = vpop.f32.mrf.mxu1 }
 0x63a   :  { %2426 = vperm.xlu0 %2942, %v3812_v60  }
 0x63e   :  { %v2487_v14 = vpop.permute.xlu2 %2486 }
 0x63f   :  { %v2533_v0 = vmul.f32 %v2487_v14, %v3990_v33  ;;  %2957 = vset.pattern.permute.xlu2 %v3273_v5 }
 0x641   :  { %v2541_v22 = vsel %vm30_vm0, %v2533_v0, 0.0 }
 0x642   :  { %v2543_v51 = vadd.f32 %v2542_v35, %v2541_v22  ;;  %2610 = vperm.xlu0 %2942, %v2602_v3  }
 0x644   :  { %v2544_v60 = vrot.slane %v2543_v51, 4 }
 0x646   :  { %v2545_v39 = vadd.f32 %v2544_v60, %v2543_v51  ;;  %v2500_v58 = vpop.permute.xlu2 %2499 }
 0x647   :  { %v2535_v4 = vmul.f32 %v2500_v58, %v2475_v59  ;;  %2732 = vperm.xlu2 %2957, %v2721_v25  }
 0x648   :  { %v2546_v61 = vrot.slane %v2545_v39, 2 }
 0x649   :  { %v2550_v23 = vsel %vm30_vm0, %v2535_v4, 0.0 }
 0x64a   :  { %v2552_v20 = vadd.f32 %v2551_v29, %v2550_v23  ;;  %2618 = vperm.xlu0 %2942, %v2604_v8   ;;  %v2547_v48 = vadd.f32 %v2546_v61, %v2545_v39  ;;  %v2621_v23 = vmul.f32 %v2607_v52, %v4045_v10 }
 0x64c   :  { %v2553_v17 = vrot.slane %v2552_v20, 4  ;;  %v2548_v12 = vrot.slane %v2547_v48, 1 }
 0x64e   :  { %v2554_v21 = vadd.f32 %v2553_v17, %v2552_v20  ;;  %v2549_v32 = vadd.f32 %v2548_v12, %v2547_v48  ;;  %v2439_v20 = vmul.f32 %v3993_v31, %v3965_v30  ;;  %v2461_v12 = vmul.f32 %v4008_v11, %v3963_v6 }
 0x650   :  { %v2555_v50 = vrot.slane %v2554_v21, 2 }
 0x652   :  { %v2556_v63 = vadd.f32 %v2555_v50, %v2554_v21  ;;  %2953 = vset.pattern.permute.xlu0 %v3273_v5  ;;  %v2622_v50 = vmul.f32 %v2607_v52, %v4051_v1 }
 0x654   :  { %v2557_v34 = vrot.slane %v2556_v63, 1 }
 0x656   :  { %v2558_v19 = vadd.f32 %v2557_v34, %v2556_v63  ;;  %v4037_v16 = vpop.permute.xlu2 %2518  ;;  %v2462_v63 = vmul.f32 %v4008_v11, %v3977_v7 }
 0x658   :  { %v4029_v53 = vsel %vm1427_vm4, %v2558_v19, %v2549_v32 }
 0x65a   :  { %2693 = vperm.xlu0 %2953, %v2682_v45   ;;  %v2648_v45 = vpop.permute.xlu1 %2647 }
 0x65b   :  { %v2660_v38 = vmul.f32 %v2648_v45, %v4043_v13  ;;  %v2661_v14 = vmul.f32 %v2648_v45, %v4049_v24 }
 0x65e   :  { %v4041_v46 = vpop.permute.xlu2 %2531 }
 0x662   :  { %2954 = vset.pattern.permute.xlu0 %v3268_v37 }
 0x667   :  { %v2644_v47 = vpop.permute.xlu2 %2643 }
 0x668   :  { %v2658_v8 = vmul.f32 %v2644_v47, %v4043_v13 }
 0x66a   :  { %2512 = vperm.xlu0 %2954, %v2507_v44   ;;  %v2652_v44 = vpop.permute.xlu1 %2651 }
 0x66b   :  { %v2663_v11 = vmul.f32 %v2652_v44, %v4049_v24 }
 0x670   :  { %v2615_v37 = vpop.permute.xlu2 %2614 }
 0x672   :  { %2726 = vperm.xlu0 %2954, %v2721_v25   ;;  %v2688_v42 = vpop.permute.xlu1 %2687  ;;  %v2440_v25 = vmul.f32 %v3993_v31, %v3979_v28 }
 0x679   :  { %v4047_v49 = vpop.permute.xlu2 %2655 }
 0x67a   :  { %2958 = vset.pattern.permute.xlu0 %v3273_v5  ;;  %v2707_v60 = vpop.permute.xlu1 %2706 }
 0x689   :  { %v2701_v26 = vpop.permute.xlu2 %2700 }
 0x69b   :  { %v2405_v43 = vpop.permute.xlu0 %2404 }
 0x69c   :  { %2408 = vst.msk [vmem:[#allocation2 - $0x4] sm:$0xf0] %vm2407_vm15, %v2405_v43 }
 0x6a3   :  { %v2455_v2 = vpop.permute.xlu0 %2454 }
 0x6a4   :  { %v2463_v29 = vmul.f32 %v2455_v2, %v3963_v6  ;;  %v2464_v61 = vmul.f32 %v2455_v2, %v3977_v7  ;;  %v2662_v6 = vmul.f32 %v2652_v44, %v4043_v13 }
 0x6a6   :  { %v2471_v34 = vsub.f32 %v2439_v20, %v2463_v29  ;;  %v2472_v32 = vsub.f32 %v2440_v25, %v2464_v61 }
 0x6a8   :  { %v2480_v52 = vadd.f32 %v2472_v32, %v3957_v9  ;;  %v2479_v2 = vadd.f32 %v2471_v34, %v3968_v36  ;;  %v2664_v34 = vmul.f32 %v4047_v49, %v4043_v13 }
 0x6aa   :  { %v2540_v9 = vmul.f32 %v4041_v46, %v2480_v52  ;;  %v2539_v36 = vmul.f32 %v4039_v18, %v2479_v2 }
 0x6ac   :  { %v2427_v5 = vpop.permute.xlu0 %2426 }
 0x6ad   :  { %v2437_v17 = vmul.f32 %v2427_v5, %v3965_v30  ;;  %v2438_v48 = vmul.f32 %v2427_v5, %v3979_v28  ;;  %v2625_v30 = vmul.f32 %v2615_v37, %v4045_v10  ;;  %v2626_v28 = vmul.f32 %v2615_v37, %v4051_v1 }
 0x6af   :  { %v2470_v31 = vsub.f32 %v2438_v48, %v2462_v63  ;;  %v2671_v37 = vsub.f32 %v2626_v28, %v2663_v11 }
 0x6b4   :  { %v2611_v56 = vpop.permute.xlu0 %2610 }
 0x6b5   :  { %v2623_v0 = vmul.f32 %v2611_v56, %v4045_v10  ;;  %v2624_v40 = vmul.f32 %v2611_v56, %v4051_v1 }
 0x6b7   :  { %v2668_v3 = vsub.f32 %v2623_v0, %v2660_v38  ;;  %v2669_v22 = vsub.f32 %v2624_v40, %v2661_v14  ;;  %v2478_v38 = vadd.f32 %v2470_v31, %v3945_v41  ;;  %v2670_v40 = vsub.f32 %v2625_v30, %v2662_v6 }
 0x6b8   :  { %v2569_v41 = vsel %vm30_vm0, %v2540_v9, 0.0 }
 0x6b9   :  { %v2676_v35 = vadd.f32 %v2668_v3, %v2475_v59  ;;  %v2677_v51 = vadd.f32 %v2669_v22, %v4017_v62  ;;  %v2659_v59 = vmul.f32 %v2644_v47, %v4049_v24  ;;  %v2666_v62 = vsub.f32 %v2621_v23, %v2658_v8 }
 0x6ba   :  { %v2469_v47 = vsub.f32 %v2437_v17, %v2461_v12  ;;  %v2679_v44 = vadd.f32 %v2671_v37, %v2478_v38  ;;  %v2538_v25 = vmul.f32 %v4037_v16, %v2478_v38 }
 0x6bb   :  { %v2736_v15 = vmul.f32 %v2701_v26, %v2676_v35  ;;  %v2737_v39 = vmul.f32 %v2707_v60, %v2677_v51  ;;  %v2667_v19 = vsub.f32 %v2622_v50, %v2659_v59  ;;  %v2674_v43 = vadd.f32 %v2666_v62, %v3990_v33  ;;  %v2720_v51 = vpop.permute.xlu1 %2719 }
 0x6bc   :  { %v2619_v21 = vpop.permute.xlu0 %2618  ;;  %v2477_v33 = vadd.f32 %v2469_v47, %v3950_v55  ;;  %v2714_v55 = vpop.permute.xlu2 %2713  ;;  %v2568_v60 = vsel %vm30_vm0, %v2539_v36, 0.0  ;;  %v2739_v46 = vmul.f32 %v2720_v51, %v2679_v44  ;;  %v2665_v59 = vmul.f32 %v4047_v49, %v4049_v24 }
 0x6bd   :  { %v2751_v58 = vsel %vm30_vm0, %v2736_v15, 0.0  ;;  %v2752_v4 = vsel %vm30_vm0, %v2737_v39, 0.0  ;;  %v2734_v5 = vmul.f32 %v2688_v42, %v2674_v43  ;;  %v2675_v7 = vadd.f32 %v2667_v19, %v3987_v27 }
 0x6be   :  { %v2753_v54 = vadd.f32 %v2752_v4, %v2751_v58  ;;  %v2678_v27 = vadd.f32 %v2670_v40, %v2477_v33  ;;  %v2570_v18 = vadd.f32 %v2569_v41, %v2568_v60  ;;  %v2761_v29 = vsel %vm30_vm0, %v2739_v46, 0.0 }
 0x6bf   :  { %v2742_v3 = vsel %vm30_vm0, %v2734_v5, 0.0  ;;  %v2627_v48 = vmul.f32 %v2619_v21, %v4045_v10  ;;  %v2560_v43 = vsel %vm30_vm0, %v2538_v25, 0.0 }
 0x6c0   :  { %v2754_v45 = vrot.slane %v2753_v54, 4  ;;  %v2738_v15 = vmul.f32 %v2714_v55, %v2678_v27  ;;  %v2571_v62 = vrot.slane %v2570_v18, 4 }
 0x6c1   :  { %v2672_v31 = vsub.f32 %v2627_v48, %v2664_v34 }
 0x6c2   :  { %v2755_v56 = vadd.f32 %v2754_v45, %v2753_v54  ;;  %v2628_v54 = vmul.f32 %v2619_v21, %v4051_v1  ;;  %v2760_v8 = vsel %vm30_vm0, %v2738_v15, 0.0  ;;  %v2572_v19 = vadd.f32 %v2571_v62, %v2570_v18 }
 0x6c3   :  { %v2762_v17 = vadd.f32 %v2761_v29, %v2760_v8 }
 0x6c4   :  { %v2756_v22 = vrot.slane %v2755_v56, 2  ;;  %v2673_v50 = vsub.f32 %v2628_v54, %v2665_v59  ;;  %v2733_v30 = vpop.permute.xlu2 %2732  ;;  %v2573_v21 = vrot.slane %v2572_v19, 2 }
 0x6c5   :  { %v2763_v47 = vrot.slane %v2762_v17, 4 }
 0x6c6   :  { %v2757_v39 = vadd.f32 %v2756_v22, %v2755_v56  ;;  %v2681_v45 = vadd.f32 %v2673_v50, %v2480_v52  ;;  %v2574_v49 = vadd.f32 %v2573_v21, %v2572_v19 }
 0x6c7   :  { %v2764_v6 = vadd.f32 %v2763_v47, %v2762_v17 }
 0x6c8   :  { %v2758_v23 = vrot.slane %v2757_v39, 1  ;;  %v2741_v5 = vmul.f32 %v2733_v30, %v2681_v45  ;;  %v2575_v37 = vrot.slane %v2574_v49, 1 }
 0x6c9   :  { %v2765_v38 = vrot.slane %v2764_v6, 2 }
 0x6ca   :  { %v2759_v12 = vadd.f32 %v2758_v23, %v2757_v39  ;;  %v2576_v22 = vadd.f32 %v2575_v37, %v2574_v49 }
 0x6cc   :  { %v2694_v14 = vpop.permute.xlu0 %2693 }
 0x6cd   :  { %v2735_v0 = vmul.f32 %v2694_v14, %v2675_v7  ;;  %v2680_v7 = vadd.f32 %v2672_v31, %v2479_v2  ;;  %v2770_v14 = vsel %vm30_vm0, %v2741_v5, 0.0 }
 0x6cf   :  { %v2743_v42 = vsel %vm30_vm0, %v2735_v0, 0.0 }
 0x6d0   :  { %v2744_v35 = vadd.f32 %v2743_v42, %v2742_v3  ;;  %v2766_v3 = vadd.f32 %v2765_v38, %v2764_v6 }
 0x6d2   :  { %v2745_v26 = vrot.slane %v2744_v35, 4 }
 0x6d4   :  { %v2746_v58 = vadd.f32 %v2745_v26, %v2744_v35  ;;  %v2767_v35 = vrot.slane %v2766_v3, 1 }
 0x6d6   :  { %v2747_v4 = vrot.slane %v2746_v58, 2  ;;  %v2768_v60 = vadd.f32 %v2767_v35, %v2766_v3 }
 0x6d8   :  { %v2748_v61 = vadd.f32 %v2747_v4, %v2746_v58 }
 0x6da   :  { %v2749_v20 = vrot.slane %v2748_v61, 1 }
 0x6dc   :  { %v2750_v63 = vadd.f32 %v2749_v20, %v2748_v61  ;;  %v2513_v1 = vpop.permute.xlu0 %2512 }
 0x6dd   :  { %v2537_v32 = vmul.f32 %v2513_v1, %v2477_v33 }
 0x6de   :  { %v2782_v24 = vsel %vm1627_vm6, %v2759_v12, %v2750_v63 }
 0x6df   :  { %v2559_v16 = vsel %vm30_vm0, %v2537_v32, 0.0  ;;  %v2783_v39 = vsel %vm1629_vm7, %v2768_v60, %v2782_v24 }
 0x6e0   :  { %v2561_v10 = vadd.f32 %v2560_v43, %v2559_v16 }
 0x6e2   :  { %v2562_v28 = vrot.slane %v2561_v10, 4 }
 0x6e4   :  { %v2563_v11 = vadd.f32 %v2562_v28, %v2561_v10  ;;  %v2727_v13 = vpop.permute.xlu0 %2726 }
 0x6e5   :  { %v2740_v33 = vmul.f32 %v2727_v13, %v2680_v7 }
 0x6e6   :  { %v2564_v56 = vrot.slane %v2563_v11, 2 }
 0x6e7   :  { %v2769_v0 = vsel %vm30_vm0, %v2740_v33, 0.0  ;;  %vm2590_vm0 = vcmask 913152  }
 0x6e8   :  { %v2565_v52 = vadd.f32 %v2564_v56, %v2563_v11  ;;  %v2771_v40 = vadd.f32 %v2770_v14, %v2769_v0 }
 0x6ea   :  { %v2566_v9 = vrot.slane %v2565_v52, 1  ;;  %v2772_v36 = vrot.slane %v2771_v40, 4 }
 0x6ec   :  { %v2567_v42 = vadd.f32 %v2566_v9, %v2565_v52  ;;  %v2773_v27 = vadd.f32 %v2772_v36, %v2771_v40 }
 0x6ee   :  { %v2774_v2 = vrot.slane %v2773_v27, 2  ;;  %v2582_v44 = vsel %vm1429_vm5, %v2567_v42, %v4029_v53 }
 0x6ef   :  { %v2583_v55 = vsel %vm1431_vm9, %v2576_v22, %v2582_v44 }
 0x6f0   :  { %v2775_v51 = vadd.f32 %v2774_v2, %v2773_v27  ;;  %v2585_v41 = vadd.f32 %v2583_v55, %v3719_v57 }
 0x6f2   :  { %v2776_v26 = vrot.slane %v2775_v51, 1  ;;  %2587 = vrot.lane.b32.xlu1 %v2585_v41, %s3007_s29 }
 0x6f4   :  { %v2777_v15 = vadd.f32 %v2776_v26, %v2775_v51 }
 0x6f6   :  { %v2784_v46 = vsel %vm1631_vm8, %v2777_v15, %v2783_v39 }
 0x6f7   :  { %v2786_v58 = vadd.f32 %v2784_v46, %v3719_v57 }
 0x6f9   :  { %2788 = vrot.lane.b32.xlu2 %v2786_v58, %s3008_s30 }
 0x753   :  { %v2789_v18 = vpop.permute.xlu2 %2788 }
 0x764   :  { %v2588_v53 = vpop.permute.xlu1 %2587 }
 0x765   :  { %2591 = vst.msk [vmem:[#allocation2] sm:$0xf] %vm2590_vm0, %v2588_v53 }
 0x766   :  { %2792 = vst.msk [vmem:[#allocation2 - $0x4] sm:$0xf0] %vm2791_vm1, %v2789_v18 }
 0x767   :  { %2803 = dma.vmem_to_hbm [thread:$0]  %s2799_s17, 64, %s2801_s20, [#allocation3]  }
 0x768   :  { %3004 = dma.done.wait [#allocation3], 64  }
 0x769   :  { %3005 = vsyncadd [#allocation3], 4294967232 }
 0x76a   :  { %2808 = vsyncpa [#allocation3], 1 }

</bundles_post_ra>
